<compile_context>
chip_gen: v5e
topology: v5e:2x2
jax: 0.10.0
libtpu: 0.0.40
codegen_flags: <defaults>
</compile_context>

<pallas_src>
import functools

import jax
import jax.numpy as jnp
from jax.experimental import pallas as pl
from jax.experimental.pallas import tpu as pltpu

_HALO = 8  # conv1-output scratch offset (keeps the big bf16 store sublane-aligned)


# ----------------------------------------------------------------------------
# Fused kernel: conv1+BN1+ReLU -> conv2+BN2 -> SE -> (+residual) -> ReLU
# One grid step = one batch row, everything stays in VMEM.
# ----------------------------------------------------------------------------
def _fused_block_kernel(*refs, n_taps1, l_out, has_down, inv_l):
    if has_down:
        (xr_ref, w1_ref, b1_ref, w2_ref, b2_ref, wd_ref, bd_ref,
         sw1_ref, sw2_ref, o_ref, h1p_ref) = refs
    else:
        (xr_ref, w1_ref, b1_ref, w2_ref, b2_ref,
         sw1_ref, sw2_ref, o_ref, h1p_ref) = refs

    planes = w2_ref.shape[-1]

    # ---- conv1 + folded BN1 + ReLU  (tap matmuls over shifted xr slices) ----
    acc1 = jnp.dot(xr_ref[0, pl.ds(0, l_out), :], w1_ref[0],
                   preferred_element_type=jnp.float32)
    for t in range(1, n_taps1):
        acc1 = acc1 + jnp.dot(xr_ref[0, pl.ds(t, l_out), :], w1_ref[t],
                              preferred_element_type=jnp.float32)
    h1 = jnp.maximum(acc1 + b1_ref[...], 0.0)

    # Store h1 (bf16) into scratch with a zero halo row on each side for conv2.
    zero2 = jnp.zeros((2, planes), h1p_ref.dtype)
    h1p_ref[_HALO - 2:_HALO, :] = zero2
    h1p_ref[pl.ds(_HALO, l_out), :] = h1.astype(h1p_ref.dtype)
    h1p_ref[_HALO + l_out:_HALO + l_out + 2, :] = zero2

    # ---- conv2 + folded BN2 (no ReLU) ----
    acc2 = jnp.dot(h1p_ref[pl.ds(_HALO - 1, l_out), :], w2_ref[0],
                   preferred_element_type=jnp.float32)
    for k in range(1, 3):
        acc2 = acc2 + jnp.dot(h1p_ref[pl.ds(_HALO - 1 + k, l_out), :], w2_ref[k],
                              preferred_element_type=jnp.float32)
    h2 = acc2 + b2_ref[...]                                   # (L_out, planes) f32

    # ---- SE: squeeze (mean over L) + excitation MLP + sigmoid ----
    pooled = jnp.sum(h2, axis=0, keepdims=True) * inv_l       # (1, planes)
    z = jnp.maximum(jnp.dot(pooled, sw1_ref[...],
                            preferred_element_type=jnp.float32), 0.0)
    logits = jnp.dot(z, sw2_ref[...], preferred_element_type=jnp.float32)
    gate = 1.0 / (1.0 + jnp.exp(-logits))                     # (1, planes)

    # ---- shortcut (fused 1x1 downsample conv + folded BN, or identity) ----
    if has_down:
        res = jnp.dot(xr_ref[0, pl.ds(1, l_out), :], wd_ref[...],
                      preferred_element_type=jnp.float32) + bd_ref[...]
    else:
        res = xr_ref[0, pl.ds(1, l_out), :].astype(jnp.float32)

    o_ref[0] = jnp.maximum(h2 * gate + res, 0.0).astype(o_ref.dtype)


# ----------------------------------------------------------------------------
# Wrapper: fold BN, fold the stride into the channel dim, launch the kernel.
# ----------------------------------------------------------------------------
def se_basic_block_forward(params, x_ncl):
    x = jnp.transpose(x_ncl, (0, 2, 1)).astype(jnp.float32)    # (B, L, C_in)
    stride = params["stride"]
    B, L, C_in = x.shape
    K, _, planes = params["conv1_w"].shape
    assert K == 3 and L % stride == 0
    L_out = L // stride
    sC = stride * C_in

    # Extended input: `stride` zero rows on each end, then a FREE reshape that
    # folds the stride into the channel dim -> xr (B, L_out + 2, stride*C_in).
    x_ext = jnp.pad(x, ((0, 0), (stride, stride), (0, 0)))
    xr = x_ext.reshape(B, L_out + 2, sC).astype(jnp.bfloat16)

    # conv1 weights with BN1 scale folded, expressed as tap matrices over xr.
    w1 = params["conv1_w"] * params["bn1_scale"][None, None, :]   # (3, C_in, planes)
    if stride == 1:
        taps1 = w1                                                # taps at rows l, l+1, l+2
    else:
        t_prev = jnp.zeros((sC, planes), jnp.float32)
        t_prev = t_prev.at[(stride - 1) * C_in: stride * C_in].set(w1[0])
        t_cur = jnp.zeros((sC, planes), jnp.float32)
        t_cur = t_cur.at[:C_in].set(w1[1]).at[C_in:2 * C_in].set(w1[2])
        taps1 = jnp.stack([t_prev, t_cur], axis=0)                # taps at rows l, l+1
    n_taps1 = int(taps1.shape[0])
    taps1 = taps1.astype(jnp.bfloat16)
    b1 = params["bn1_bias"].reshape(1, planes).astype(jnp.float32)

    w2 = (params["conv2_w"] * params["bn2_scale"][None, None, :]).astype(jnp.bfloat16)
    b2 = params["bn2_bias"].reshape(1, planes).astype(jnp.float32)

    sw1 = params["se_w1"].astype(jnp.float32)
    sw2 = params["se_w2"].astype(jnp.float32)
    c_r = sw1.shape[1]

    has_down = params["down_w"] is not None
    operands = [xr, taps1, b1, w2, b2]
    in_specs = [
        pl.BlockSpec((1, L_out + 2, sC), lambda b: (b, 0, 0)),
        pl.BlockSpec((n_taps1, sC, planes), lambda b: (0, 0, 0)),
        pl.BlockSpec((1, planes), lambda b: (0, 0)),
        pl.BlockSpec((3, planes, planes), lambda b: (0, 0, 0)),
        pl.BlockSpec((1, planes), lambda b: (0, 0)),
    ]
    if has_down:
        wd = params["down_w"][0] * params["down_scale"][None, :]      # (C_in, planes)
        wd_ext = jnp.zeros((sC, planes), jnp.float32).at[:C_in].set(wd)
        operands += [wd_ext.astype(jnp.bfloat16),
                     params["down_bias"].reshape(1, planes).astype(jnp.float32)]
        in_specs += [pl.BlockSpec((sC, planes), lambda b: (0, 0)),
                     pl.BlockSpec((1, planes), lambda b: (0, 0))]
    else:
        assert stride == 1 and C_in == planes
    operands += [sw1, sw2]
    in_specs += [pl.BlockSpec((planes, c_r), lambda b: (0, 0)),
                 pl.BlockSpec((c_r, planes), lambda b: (0, 0))]

    kernel = functools.partial(_fused_block_kernel, n_taps1=n_taps1,
                               l_out=L_out, has_down=has_down, inv_l=1.0 / L_out)

    out = pl.pallas_call(
        kernel,
        out_shape=jax.ShapeDtypeStruct((B, L_out, planes), jnp.float32),
        grid=(B,),
        in_specs=in_specs,
        out_specs=pl.BlockSpec((1, L_out, planes), lambda b: (b, 0, 0)),
        scratch_shapes=[pltpu.VMEM((L_out + 2 * _HALO, planes), jnp.bfloat16)],
        compiler_params=pltpu.CompilerParams(dimension_semantics=("parallel",)),
    )(*operands)
    return jnp.transpose(out, (0, 2, 1))                       # back to (B, C, L_out)


# ----------------------------------------------------------------------------
# Parameters (deterministic, synthetic; matches SEBasicBlock1D structure).
# ----------------------------------------------------------------------------
def init_params(key, inplanes, planes, stride, reduction=16):
    keys = iter(jax.random.split(key, 32))

    def conv_w(c_in, c_out, k):
        std = (2.0 / (c_in * k)) ** 0.5
        return jax.random.normal(next(keys), (k, c_in, c_out), jnp.float32) * std

    def bn(c):
        eps = 1e-5
        gamma = 1.0 + 0.1 * jax.random.normal(next(keys), (c,), jnp.float32)
        beta = 0.1 * jax.random.normal(next(keys), (c,), jnp.float32)
        mean = 0.1 * jax.random.normal(next(keys), (c,), jnp.float32)
        var = jnp.abs(1.0 + 0.1 * jax.random.normal(next(keys), (c,), jnp.float32))
        scale = gamma / jnp.sqrt(var + eps)
        bias = beta - mean * scale
        return scale, bias

    c_r = max(planes // reduction, 1)
    params = {
        "stride": stride,
        "conv1_w": conv_w(inplanes, planes, 3),
        "conv2_w": conv_w(planes, planes, 3),
        "se_w1": jax.random.normal(next(keys), (planes, c_r), jnp.float32)
                 * (1.0 / planes ** 0.5),
        "se_w2": jax.random.normal(next(keys), (c_r, planes), jnp.float32)
                 * (1.0 / c_r ** 0.5),
    }
    params["bn1_scale"], params["bn1_bias"] = bn(planes)
    params["bn2_scale"], params["bn2_bias"] = bn(planes)
    if stride != 1 or inplanes != planes:
        params["down_w"] = conv_w(inplanes, planes, 1)
        params["down_scale"], params["down_bias"] = bn(planes)
    else:
        params["down_w"] = None
    return params


# ----------------------------------------------------------------------------
# Pure-JAX reference (f32) for a numerical sanity check.
# ----------------------------------------------------------------------------
def _ref_forward(params, x_ncl):
    x = jnp.transpose(x_ncl, (0, 2, 1))

    def conv(h, w, stride, padding):
        return jax.lax.conv_general_dilated(
            h, w, window_strides=(stride,), padding=[(padding, padding)],
            dimension_numbers=("NWC", "WIO", "NWC"))

    s = params["stride"]
    h = jnp.maximum(conv(x, params["conv1_w"], s, 1) * params["bn1_scale"]
                    + params["bn1_bias"], 0.0)
    h = conv(h, params["conv2_w"], 1, 1) * params["bn2_scale"] + params["bn2_bias"]
    pooled = jnp.mean(h, axis=1)                              # (B, C)
    z = jnp.maximum(pooled @ params["se_w1"], 0.0)
    se = jax.nn.sigmoid(z @ params["se_w2"])
    h = h * se[:, None, :]
    if params["down_w"] is not None:
        r = (conv(x, params["down_w"], s, 0) * params["down_scale"]
             + params["down_bias"])
    else:
        r = x
    return jnp.transpose(jnp.maximum(h + r, 0.0), (0, 2, 1))


if __name__ == "__main__":
    key = jax.random.PRNGKey(0)

    # Config A: strided block with a downsample shortcut.
    # Config B: stride-1 block with an identity shortcut.
    configs = [
        dict(B=2, inplanes=64, planes=128, L=512, stride=2),
        dict(B=2, inplanes=128, planes=128, L=512, stride=1),
    ]
    for i, cfg in enumerate(configs):
        pkey, xkey = jax.random.split(jax.random.fold_in(key, i))
        params = init_params(pkey, cfg["inplanes"], cfg["planes"], cfg["stride"],
                             reduction=16)
        x = jax.random.normal(xkey, (cfg["B"], cfg["inplanes"], cfg["L"]),
                              jnp.float32)                     # PyTorch (B, C, L)

        out = jax.block_until_ready(se_basic_block_forward(params, x))

        L_out = cfg["L"] // cfg["stride"]
        assert out.shape == (cfg["B"], cfg["planes"], L_out), out.shape
        assert bool(jnp.all(jnp.isfinite(out)))

        # bf16 matmul operands / f32 accumulation vs. f32 reference.
        ref = _ref_forward(params, x)
        assert bool(jnp.allclose(out, ref, rtol=1e-1, atol=1e-1)), \
            float(jnp.max(jnp.abs(out - ref)))

    print("KERNEL_OK")
</pallas_src>

<mosaic_0001>
module attributes {stable_mosaic.version = 11 : i64} {
  func.func @_fused_block_kernel(%arg0: i32, %arg1: memref<1x258x128xbf16, #tpu.memory_space<vmem>>, %arg2: memref<2x128x128xbf16, #tpu.memory_space<vmem>>, %arg3: memref<1x128xf32, #tpu.memory_space<vmem>>, %arg4: memref<3x128x128xbf16, #tpu.memory_space<vmem>>, %arg5: memref<1x128xf32, #tpu.memory_space<vmem>>, %arg6: memref<128x128xbf16, #tpu.memory_space<vmem>>, %arg7: memref<1x128xf32, #tpu.memory_space<vmem>>, %arg8: memref<128x8xf32, #tpu.memory_space<vmem>>, %arg9: memref<8x128xf32, #tpu.memory_space<vmem>>, %arg10: memref<1x256x128xf32, #tpu.memory_space<vmem>>, %arg11: memref<272x128xbf16, #tpu.memory_space<vmem>>) attributes {dimension_semantics = [#tpu.dimension_semantics<parallel>], iteration_bounds = array<i64: 2>, scalar_prefetch = 0 : i64, scratch_operands = 1 : i64, tpu.core_type = #tpu.core_type<tc>, window_params = [{transform_indices = @transform_0, window_bounds = array<i64: 1, 258, 128>}, {pipeline_mode = #tpu.pipeline_mode<synchronous>, transform_indices = @transform_1, window_bounds = array<i64: 2, 128, 128>}, {pipeline_mode = #tpu.pipeline_mode<synchronous>, transform_indices = @transform_2, window_bounds = array<i64: 1, 128>}, {pipeline_mode = #tpu.pipeline_mode<synchronous>, transform_indices = @transform_3, window_bounds = array<i64: 3, 128, 128>}, {pipeline_mode = #tpu.pipeline_mode<synchronous>, transform_indices = @transform_4, window_bounds = array<i64: 1, 128>}, {pipeline_mode = #tpu.pipeline_mode<synchronous>, transform_indices = @transform_5, window_bounds = array<i64: 128, 128>}, {pipeline_mode = #tpu.pipeline_mode<synchronous>, transform_indices = @transform_6, window_bounds = array<i64: 1, 128>}, {pipeline_mode = #tpu.pipeline_mode<synchronous>, transform_indices = @transform_7, window_bounds = array<i64: 128, 8>}, {pipeline_mode = #tpu.pipeline_mode<synchronous>, transform_indices = @transform_8, window_bounds = array<i64: 8, 128>}, {transform_indices = @transform_9, window_bounds = array<i64: 1, 256, 128>}]} {
    %c0 = arith.constant 0 : index
    %c0_0 = arith.constant 0 : index
    %c0_1 = arith.constant 0 : index
    %0 = vector.load %arg1[%c0, %c0_0, %c0_1] : memref<1x258x128xbf16, #tpu.memory_space<vmem>>, vector<1x256x128xbf16>
    %1 = vector.shape_cast %0 : vector<1x256x128xbf16> to vector<256x128xbf16>
    %c0_2 = arith.constant 0 : index
    %c0_3 = arith.constant 0 : index
    %c0_4 = arith.constant 0 : index
    %2 = vector.load %arg2[%c0_2, %c0_3, %c0_4] : memref<2x128x128xbf16, #tpu.memory_space<vmem>>, vector<1x128x128xbf16>
    %3 = vector.shape_cast %2 : vector<1x128x128xbf16> to vector<128x128xbf16>
    %cst = arith.constant dense<0.000000e+00> : vector<256x128xf32>
    %4 = tpu.matmul %1, %3, %cst {dimension_numbers = #tpu.dot_dimension_numbers<[1], [0], [0], [1], [0, 0, 1, 1], [], []>} : vector<256x128xbf16>, vector<128x128xbf16>, vector<256x128xf32> -> vector<256x128xf32>
    %c0_5 = arith.constant 0 : index
    %c1 = arith.constant 1 : index
    %c0_6 = arith.constant 0 : index
    %5 = vector.load %arg1[%c0_5, %c1, %c0_6] : memref<1x258x128xbf16, #tpu.memory_space<vmem>>, vector<1x256x128xbf16>
    %6 = vector.shape_cast %5 : vector<1x256x128xbf16> to vector<256x128xbf16>
    %c1_7 = arith.constant 1 : index
    %c0_8 = arith.constant 0 : index
    %c0_9 = arith.constant 0 : index
    %7 = vector.load %arg2[%c1_7, %c0_8, %c0_9] : memref<2x128x128xbf16, #tpu.memory_space<vmem>>, vector<1x128x128xbf16>
    %8 = vector.shape_cast %7 : vector<1x128x128xbf16> to vector<128x128xbf16>
    %cst_10 = arith.constant dense<0.000000e+00> : vector<256x128xf32>
    %9 = tpu.matmul %6, %8, %cst_10 {dimension_numbers = #tpu.dot_dimension_numbers<[1], [0], [0], [1], [0, 0, 1, 1], [], []>} : vector<256x128xbf16>, vector<128x128xbf16>, vector<256x128xf32> -> vector<256x128xf32>
    %10 = arith.addf %4, %9 : vector<256x128xf32>
    %c0_11 = arith.constant 0 : index
    %c0_12 = arith.constant 0 : index
    %11 = vector.load %arg3[%c0_11, %c0_12] : memref<1x128xf32, #tpu.memory_space<vmem>>, vector<1x128xf32>
    %12 = vector.broadcast %11 : vector<1x128xf32> to vector<256x128xf32>
    %13 = arith.addf %10, %12 : vector<256x128xf32>
    %cst_13 = arith.constant 0.000000e+00 : f32
    %14 = vector.broadcast %cst_13 : f32 to vector<256x128xf32>
    %15 = arith.maximumf %13, %14 : vector<256x128xf32>
    %cst_14 = arith.constant 0.000000e+00 : bf16
    %16 = vector.broadcast %cst_14 : bf16 to vector<2x128xbf16>
    %c6 = arith.constant 6 : index
    %c0_15 = arith.constant 0 : index
    %17 = vector.load %arg11[%c6, %c0_15] : memref<272x128xbf16, #tpu.memory_space<vmem>>, vector<2x128xbf16>
    tpu.vector_store %arg11[%c6, %c0_15], %16 {strides = array<i32>} : memref<272x128xbf16, #tpu.memory_space<vmem>>, vector<2x128xbf16>,
    %18 = arith.truncf %15 : vector<256x128xf32> to vector<256x128xbf16>
    %c8 = arith.constant 8 : index
    %c0_16 = arith.constant 0 : index
    %19 = vector.load %arg11[%c8, %c0_16] : memref<272x128xbf16, #tpu.memory_space<vmem>>, vector<256x128xbf16>
    tpu.vector_store %arg11[%c8, %c0_16], %18 {strides = array<i32>} : memref<272x128xbf16, #tpu.memory_space<vmem>>, vector<256x128xbf16>,
    %c264 = arith.constant 264 : index
    %c0_17 = arith.constant 0 : index
    %20 = vector.load %arg11[%c264, %c0_17] : memref<272x128xbf16, #tpu.memory_space<vmem>>, vector<2x128xbf16>
    tpu.vector_store %arg11[%c264, %c0_17], %16 {strides = array<i32>} : memref<272x128xbf16, #tpu.memory_space<vmem>>, vector<2x128xbf16>,
    %c7 = arith.constant 7 : index
    %c0_18 = arith.constant 0 : index
    %21 = vector.load %arg11[%c7, %c0_18] : memref<272x128xbf16, #tpu.memory_space<vmem>>, vector<256x128xbf16>
    %c0_19 = arith.constant 0 : index
    %c0_20 = arith.constant 0 : index
    %c0_21 = arith.constant 0 : index
    %22 = vector.load %arg4[%c0_19, %c0_20, %c0_21] : memref<3x128x128xbf16, #tpu.memory_space<vmem>>, vector<1x128x128xbf16>
    %23 = vector.shape_cast %22 : vector<1x128x128xbf16> to vector<128x128xbf16>
    %cst_22 = arith.constant dense<0.000000e+00> : vector<256x128xf32>
    %24 = tpu.matmul %21, %23, %cst_22 {dimension_numbers = #tpu.dot_dimension_numbers<[1], [0], [0], [1], [0, 0, 1, 1], [], []>} : vector<256x128xbf16>, vector<128x128xbf16>, vector<256x128xf32> -> vector<256x128xf32>
    %c8_23 = arith.constant 8 : index
    %c0_24 = arith.constant 0 : index
    %25 = vector.load %arg11[%c8_23, %c0_24] : memref<272x128xbf16, #tpu.memory_space<vmem>>, vector<256x128xbf16>
    %c1_25 = arith.constant 1 : index
    %c0_26 = arith.constant 0 : index
    %c0_27 = arith.constant 0 : index
    %26 = vector.load %arg4[%c1_25, %c0_26, %c0_27] : memref<3x128x128xbf16, #tpu.memory_space<vmem>>, vector<1x128x128xbf16>
    %27 = vector.shape_cast %26 : vector<1x128x128xbf16> to vector<128x128xbf16>
    %cst_28 = arith.constant dense<0.000000e+00> : vector<256x128xf32>
    %28 = tpu.matmul %25, %27, %cst_28 {dimension_numbers = #tpu.dot_dimension_numbers<[1], [0], [0], [1], [0, 0, 1, 1], [], []>} : vector<256x128xbf16>, vector<128x128xbf16>, vector<256x128xf32> -> vector<256x128xf32>
    %29 = arith.addf %24, %28 : vector<256x128xf32>
    %c9 = arith.constant 9 : index
    %c0_29 = arith.constant 0 : index
    %30 = vector.load %arg11[%c9, %c0_29] : memref<272x128xbf16, #tpu.memory_space<vmem>>, vector<256x128xbf16>
    %c2 = arith.constant 2 : index
    %c0_30 = arith.constant 0 : index
    %c0_31 = arith.constant 0 : index
    %31 = vector.load %arg4[%c2, %c0_30, %c0_31] : memref<3x128x128xbf16, #tpu.memory_space<vmem>>, vector<1x128x128xbf16>
    %32 = vector.shape_cast %31 : vector<1x128x128xbf16> to vector<128x128xbf16>
    %cst_32 = arith.constant dense<0.000000e+00> : vector<256x128xf32>
    %33 = tpu.matmul %30, %32, %cst_32 {dimension_numbers = #tpu.dot_dimension_numbers<[1], [0], [0], [1], [0, 0, 1, 1], [], []>} : vector<256x128xbf16>, vector<128x128xbf16>, vector<256x128xf32> -> vector<256x128xf32>
    %34 = arith.addf %29, %33 : vector<256x128xf32>
    %c0_33 = arith.constant 0 : index
    %c0_34 = arith.constant 0 : index
    %35 = vector.load %arg5[%c0_33, %c0_34] : memref<1x128xf32, #tpu.memory_space<vmem>>, vector<1x128xf32>
    %36 = vector.broadcast %35 : vector<1x128xf32> to vector<256x128xf32>
    %37 = arith.addf %34, %36 : vector<256x128xf32>
    %cst_35 = arith.constant dense<0.000000e+00> : vector<128xf32>
    %38 = vector.multi_reduction <add>, %37, %cst_35 [0] : vector<256x128xf32> to vector<128xf32>
    %39 = vector.shape_cast %38 : vector<128xf32> to vector<1x128xf32>
    %cst_36 = arith.constant 3.906250e-03 : f32
    %40 = vector.broadcast %cst_36 : f32 to vector<1x128xf32>
    %41 = arith.mulf %39, %40 : vector<1x128xf32>
    %c0_37 = arith.constant 0 : index
    %c0_38 = arith.constant 0 : index
    %42 = vector.load %arg8[%c0_37, %c0_38] : memref<128x8xf32, #tpu.memory_space<vmem>>, vector<128x8xf32>
    %cst_39 = arith.constant dense<0.000000e+00> : vector<1x8xf32>
    %43 = tpu.matmul %41, %42, %cst_39 {dimension_numbers = #tpu.dot_dimension_numbers<[1], [0], [0], [1], [0, 0, 1, 1], [], []>} : vector<1x128xf32>, vector<128x8xf32>, vector<1x8xf32> -> vector<1x8xf32>
    %cst_40 = arith.constant 0.000000e+00 : f32
    %44 = vector.broadcast %cst_40 : f32 to vector<1x8xf32>
    %45 = arith.maximumf %43, %44 : vector<1x8xf32>
    %c0_41 = arith.constant 0 : index
    %c0_42 = arith.constant 0 : index
    %46 = vector.load %arg9[%c0_41, %c0_42] : memref<8x128xf32, #tpu.memory_space<vmem>>, vector<8x128xf32>
    %cst_43 = arith.constant dense<0.000000e+00> : vector<1x128xf32>
    %47 = tpu.matmul %45, %46, %cst_43 {dimension_numbers = #tpu.dot_dimension_numbers<[1], [0], [0], [1], [0, 0, 1, 1], [], []>} : vector<1x8xf32>, vector<8x128xf32>, vector<1x128xf32> -> vector<1x128xf32>
    %cst_44 = arith.constant 0.000000e+00 : f32
    %48 = vector.broadcast %cst_44 : f32 to vector<1x128xf32>
    %49 = arith.subf %48, %47 : vector<1x128xf32>
    %50 = math.exp %49 : vector<1x128xf32>
    %cst_45 = arith.constant 1.000000e+00 : f32
    %51 = vector.broadcast %cst_45 : f32 to vector<1x128xf32>
    %52 = arith.addf %51, %50 : vector<1x128xf32>
    %cst_46 = arith.constant 1.000000e+00 : f32
    %53 = vector.broadcast %cst_46 : f32 to vector<1x128xf32>
    %54 = arith.divf %53, %52 : vector<1x128xf32>
    %c0_47 = arith.constant 0 : index
    %c1_48 = arith.constant 1 : index
    %c0_49 = arith.constant 0 : index
    %55 = vector.load %arg1[%c0_47, %c1_48, %c0_49] : memref<1x258x128xbf16, #tpu.memory_space<vmem>>, vector<1x256x128xbf16>
    %56 = vector.shape_cast %55 : vector<1x256x128xbf16> to vector<256x128xbf16>
    %c0_50 = arith.constant 0 : index
    %c0_51 = arith.constant 0 : index
    %57 = vector.load %arg6[%c0_50, %c0_51] : memref<128x128xbf16, #tpu.memory_space<vmem>>, vector<128x128xbf16>
    %cst_52 = arith.constant dense<0.000000e+00> : vector<256x128xf32>
    %58 = tpu.matmul %56, %57, %cst_52 {dimension_numbers = #tpu.dot_dimension_numbers<[1], [0], [0], [1], [0, 0, 1, 1], [], []>} : vector<256x128xbf16>, vector<128x128xbf16>, vector<256x128xf32> -> vector<256x128xf32>
    %c0_53 = arith.constant 0 : index
    %c0_54 = arith.constant 0 : index
    %59 = vector.load %arg7[%c0_53, %c0_54] : memref<1x128xf32, #tpu.memory_space<vmem>>, vector<1x128xf32>
    %60 = vector.broadcast %59 : vector<1x128xf32> to vector<256x128xf32>
    %61 = arith.addf %58, %60 : vector<256x128xf32>
    %62 = vector.broadcast %54 : vector<1x128xf32> to vector<256x128xf32>
    %63 = arith.mulf %37, %62 : vector<256x128xf32>
    %64 = arith.addf %63, %61 : vector<256x128xf32>
    %cst_55 = arith.constant 0.000000e+00 : f32
    %65 = vector.broadcast %cst_55 : f32 to vector<256x128xf32>
    %66 = arith.maximumf %64, %65 : vector<256x128xf32>
    %c0_56 = arith.constant 0 : index
    %c0_57 = arith.constant 0 : index
    %c0_58 = arith.constant 0 : index
    %67 = vector.load %arg10[%c0_56, %c0_57, %c0_58] : memref<1x256x128xf32, #tpu.memory_space<vmem>>, vector<1x256x128xf32>
    %68 = vector.shape_cast %67 : vector<1x256x128xf32> to vector<256x128xf32>
    %69 = vector.shape_cast %66 : vector<256x128xf32> to vector<1x256x128xf32>
    tpu.vector_store %arg10[%c0_56, %c0_57, %c0_58], %69 {strides = array<i32>} : memref<1x256x128xf32, #tpu.memory_space<vmem>>, vector<1x256x128xf32>,
    return
  }
  func.func @transform_0(%arg0: i32) -> (i32, i32, i32) {
    %c0_i32 = arith.constant 0 : i32
    %c0_i32_0 = arith.constant 0 : i32
    %c0_i32_1 = arith.constant 0 : i32
    return %arg0, %c0_i32, %c0_i32_0 : i32, i32, i32
  }
  func.func @transform_1(%arg0: i32) -> (i32, i32, i32) {
    %c0_i32 = arith.constant 0 : i32
    %c0_i32_0 = arith.constant 0 : i32
    %c0_i32_1 = arith.constant 0 : i32
    %c0_i32_2 = arith.constant 0 : i32
    return %c0_i32, %c0_i32_0, %c0_i32_1 : i32, i32, i32
  }
  func.func @transform_2(%arg0: i32) -> (i32, i32) {
    %c0_i32 = arith.constant 0 : i32
    %c0_i32_0 = arith.constant 0 : i32
    %c0_i32_1 = arith.constant 0 : i32
    return %c0_i32, %c0_i32_0 : i32, i32
  }
  func.func @transform_3(%arg0: i32) -> (i32, i32, i32) {
    %c0_i32 = arith.constant 0 : i32
    %c0_i32_0 = arith.constant 0 : i32
    %c0_i32_1 = arith.constant 0 : i32
    %c0_i32_2 = arith.constant 0 : i32
    return %c0_i32, %c0_i32_0, %c0_i32_1 : i32, i32, i32
  }
  func.func @transform_4(%arg0: i32) -> (i32, i32) {
    %c0_i32 = arith.constant 0 : i32
    %c0_i32_0 = arith.constant 0 : i32
    %c0_i32_1 = arith.constant 0 : i32
    return %c0_i32, %c0_i32_0 : i32, i32
  }
  func.func @transform_5(%arg0: i32) -> (i32, i32) {
    %c0_i32 = arith.constant 0 : i32
    %c0_i32_0 = arith.constant 0 : i32
    %c0_i32_1 = arith.constant 0 : i32
    return %c0_i32, %c0_i32_0 : i32, i32
  }
  func.func @transform_6(%arg0: i32) -> (i32, i32) {
    %c0_i32 = arith.constant 0 : i32
    %c0_i32_0 = arith.constant 0 : i32
    %c0_i32_1 = arith.constant 0 : i32
    return %c0_i32, %c0_i32_0 : i32, i32
  }
  func.func @transform_7(%arg0: i32) -> (i32, i32) {
    %c0_i32 = arith.constant 0 : i32
    %c0_i32_0 = arith.constant 0 : i32
    %c0_i32_1 = arith.constant 0 : i32
    return %c0_i32, %c0_i32_0 : i32, i32
  }
  func.func @transform_8(%arg0: i32) -> (i32, i32) {
    %c0_i32 = arith.constant 0 : i32
    %c0_i32_0 = arith.constant 0 : i32
    %c0_i32_1 = arith.constant 0 : i32
    return %c0_i32, %c0_i32_0 : i32, i32
  }
  func.func @transform_9(%arg0: i32) -> (i32, i32, i32) {
    %c0_i32 = arith.constant 0 : i32
    %c0_i32_0 = arith.constant 0 : i32
    %c0_i32_1 = arith.constant 0 : i32
    return %arg0, %c0_i32, %c0_i32_0 : i32, i32, i32
  }
}

</mosaic_0001>

<bundles_post_ra>
// kernel: tpu_custom_call.1
= control target key start
LH: loop header
LB: loop body
LE: loop exit
PB: predicated region body
PF: predicated region fallthrough
CT: control target
= control target key end

     0   :  { %14 = vsyncpa [#allocation4], 0  ;;  %s4946_s0 = inlined_call_operand.vmem [shape: bf16[2,258,128], index: 0, kind: input, shape index: {}]   ;;  %s4947_s1 = inlined_call_operand.vmem [shape: bf16[2,128,128], index: 1, kind: input, shape index: {}]   ;;  %s4948_s2 = inlined_call_operand.vmem [shape: f32[1,128], index: 2, kind: input, shape index: {}]   ;;  %s4949_s3 = inlined_call_operand.vmem [shape: bf16[3,128,128], index: 3, kind: input, shape index: {}]   ;;  %s4950_s4 = inlined_call_operand.vmem [shape: f32[1,128], index: 4, kind: input, shape index: {}]   ;;  %s4951_s5 = inlined_call_operand.vmem [shape: bf16[128,128], index: 5, kind: input, shape index: {}]   ;;  %s4952_s6 = inlined_call_operand.vmem [shape: f32[1,128], index: 6, kind: input, shape index: {}]   ;;  %s4953_s7 = inlined_call_operand.vmem [shape: f32[128,8], index: 7, kind: input, shape index: {}]   ;;  %s4954_s8 = inlined_call_operand.vmem [shape: f32[8,128], index: 8, kind: input, shape index: {}]   ;;  %s4955_s9 = inlined_call_operand.hbm [shape: f32[2,256,128], index: 9, kind: output, shape index: {}]  }
   0x1   :  { %16 = vsyncpa [#allocation4 + $0x1], 0  ;;  %s3898_s30 = smov 0   ;;  %s3900_s10 = smov 0  }
   0x2   :  { %s3902_s11 = smov 0   ;;  %s3904_s12 = smov 0  }
   0x3 LB: > { %s3919_s13 = sadd.s32 4294967295, %s3843_s12   ;;  %s2911_s14 = sadd.s32 4294967294, %s3843_s12   ;;  %s3843_s12 = sphi %s3904_s12, %s5012_s12   ;;  %s3839_s11 = sphi %s3902_s11, %s5011_s11   ;;  %s3835_s10 = sphi %s3900_s10, %s5010_s10   ;;  %s3831_s30 = sphi %s3898_s30, %s5009_s30  }
   0x4   : > { %s3923_s15 = sadd.s32 1, %s3843_s12   ;;  %s223_s16 = sadd.s32 1, %s3839_s11 }
   0x5   : > { %s220_s17 = ssub.s32 %s3843_s12, %s3923_s15  ;;  %p233_p0 = scmp.ne.s32.totalorder %s3839_s11, %s3835_s10 }
   0x6   : > { %p221_p1 = scmp.eq.s32.totalorder %s220_s17, 0  ;;  %p234_p2 = scmp.eq.s32.totalorder %s3919_s13, 1 }
   0x7   : > { %p239_p3 = scmp.ne.s32.totalorder %s3835_s10, %s3831_s30  ;;  %p240_p4 = scmp.eq.s32.totalorder %s2911_s14, 1 }
   0x8   : > { %s3934_s18 = scalar_select %p221_p1, %s3839_s11, %s223_s16  }
   0x9   : > { %p3936_p5 = por %p234_p2, %p233_p0  ;;  %p3940_p6 = por %p240_p4, %p239_p3 }
   0xa   : > { %p2914_p7 = scmp.ge.s32.totalorder %s3843_s12, 1  ;;  %p290_p8 = scmp.lt.s32.totalorder %s3843_s12, 3 }
   0xc   : > { %p291_p9 = pnand %p2914_p7, %p290_p8 }
   0xe   : > { %294 = sbr.rel (%p291_p9) target bundleno = 1205 (0x4b5), region = 56 }
  0x13   : > { %v3386_v0 = vld [vmem:[%s4947_s1 + $0x78] sm:$0xff]  ;;  %p326_p10 = scmp.lt.s32.totalorder %s3919_s13, 1  ;;  %v3385_v1 = vld [vmem:[%s4947_s1 + $0x70] sm:$0xff]  ;;  %v3384_v2 = vld [vmem:[%s4947_s1 + $0x68] sm:$0xff]  ;;  %vm481_vm0 = vsmask.f32 7424 }
  0x14   : > { %3687 = vmatpush.bf16.msra.mxu1 %v3386_v0  ;;  %678 = vmatpush.bf16.msra.mxu0 %v3386_v0  ;;  %v3383_v3 = vld [vmem:[%s4947_s1 + $0x60] sm:$0xff]  ;;  %v3382_v4 = vld [vmem:[%s4947_s1 + $0x58] sm:$0xff]  ;;  %v3381_v6 = vld [vmem:[%s4947_s1 + $0x50] sm:$0xff]  ;;  %vm1372_vm1 = vsmask.f32 4352  ;;  %vm2240_vm2 = vcmask 64512  }
  0x15   : > { %s327_s25 = scalar_select %p326_p10, %s3919_s13, 1  ;;  %v3380_v9 = vld [vmem:[%s4947_s1 + $0x48] sm:$0xff]  ;;  %v3379_v13 = vld [vmem:[%s4947_s1 + $0x40] sm:$0xff]  ;;  %v3378_v16 = vld [vmem:[%s4947_s1 + $0x38] sm:$0xff] }
  0x16   : > { %v3377_v18 = vld [vmem:[%s4947_s1 + $0x30] sm:$0xff]  ;;  %v3376_v20 = vld [vmem:[%s4947_s1 + $0x28] sm:$0xff]  ;;  %v3375_v23 = vld [vmem:[%s4947_s1 + $0x20] sm:$0xff]  ;;  %s3451_s16 = sshll.u32 %s3919_s13, 8 }
  0x17   : > { %s3731_s28 = smul.u32 132, %s327_s25  ;;  %v3374_v27 = vld [vmem:[%s4947_s1 + $0x18] sm:$0xff]  ;;  %v3373_v34 = vld [vmem:[%s4947_s1 + $0x10] sm:$0xff]  ;;  %v3372_v41 = vld [vmem:[%s4947_s1 + $0x8] sm:$0xff]  ;;  %s2845_s22 = scalar_lea.hbm %s4955_s9, %s3451_s16 }
  0x18   : > { %3688 = vmatpush.bf16.msra.mxu1 %v3385_v1  ;;  %679 = vmatpush.bf16.msra.mxu0 %v3385_v1  ;;  %v3371_v49 = vld [vmem:[%s4947_s1] sm:$0xff]  ;;  %s2848_s24 = sshll.u32 %s2845_s22, 4  ;;  %s3801_s16 = scalar_lea.hbm %s4955_s9, 512  ;;  %s2849_s24 = int_to_ptr.hbm [resolvable:$true] %s2848_s24 }
  0x19   : > { %s3963_s21 = scalar_lea.vmem %s4946_s0, %s3731_s28  ;;  %s3795_s26 = sshra.s32 %s2849_s24, 4  ;;  %s3796_s26 = int_to_ptr.hbm [resolvable:$true] %s3795_s26 }
  0x1a   : > { %v3969_v5 = vld [vmem:[%s3963_s21 + $0x48] sm:$0xff]  ;;  %v3975_v7 = vld [vmem:[%s3963_s21 + $0x50] sm:$0xff]  ;;  %v3997_v19 = vld [vmem:[%s3963_s21 + $0x58] sm:$0xff]  ;;  %s3797_s27 = scalar_lea.hbm %s3796_s26, 256  ;;  %p3802_p0 = scmp.lt.s32.totalorder %s3796_s26, %s4955_s9 }
  0x1b   : > { %v554_v8 = vshll.u32 %v3969_v5, 16  ;;  %v558_v11 = vshrl.u32 %v3969_v5, 16  ;;  %v562_v12 = vshll.u32 %v3975_v7, 16  ;;  %v566_v21 = vshrl.u32 %v3975_v7, 16  ;;  %v4012_v28 = vld [vmem:[%s3963_s21 + $0x60] sm:$0xff]  ;;  %v4021_v35 = vld [vmem:[%s3963_s21 + $0x68] sm:$0xff]  ;;  %p3798_p11 = scmp.ne.s32.totalorder %s3796_s26, %s3797_s27  ;;  %p3803_p1 = scmp.lt.s32.totalorder %s3801_s16, %s3797_s27 }
  0x1c   : > { %3689 = vmatpush.bf16.msra.mxu1 %v3384_v2  ;;  %680 = vmatpush.bf16.msra.mxu0 %v3384_v2  ;;  %v570_v22 = vshll.u32 %v3997_v19, 16  ;;  %v574_v29 = vshrl.u32 %v3997_v19, 16  ;;  %v578_v30 = vshll.u32 %v4012_v28, 16  ;;  %v582_v36 = vshrl.u32 %v4012_v28, 16  ;;  %v4030_v42 = vld [vmem:[%s3963_s21 + $0x70] sm:$0xff]  ;;  %v3355_v48 = vld [vmem:[%s3963_s21] sm:$0xff] }
  0x1d   : > { %v3981_v10 = vrot.slane %v554_v8, 1  ;;  %v564_v15 = vrot.slane %v562_v12, 1  ;;  %v586_v37 = vshll.u32 %v4021_v35, 16  ;;  %v590_v43 = vshrl.u32 %v4021_v35, 16  ;;  %v3356_v50 = vld [vmem:[%s3963_s21 + $0x8] sm:$0xff]  ;;  %v4041_v51 = vld [vmem:[%s3963_s21 + $0x78] sm:$0xff]  ;;  %p3799_p12 = pnand %p3798_p11, %p3936_p5  ;;  %p3804_p2 = por %p3803_p1, %p3802_p0 }
  0x1e   : > { %v572_v25 = vrot.slane %v570_v22, 1  ;;  %v580_v32 = vrot.slane %v578_v30, 1  ;;  %v594_v44 = vshll.u32 %v4030_v42, 16  ;;  %v483_v52 = vshrl.u32 %v3355_v48, 16  ;;  %v380_v63 = vld [vmem:[%s3963_s21 + $0x80] sm:$0x1] }
  0x1f   : > { %v560_v14 = vor.u32 %v558_v11, %v3981_v10  ;;  %v568_v24 = vor.u32 %v566_v21, %v564_v15  ;;  %v588_v39 = vrot.slane %v586_v37, 1  ;;  %v485_v53 = vshll.u32 %v3355_v48, 16  ;;  %v3357_v2 = vld [vmem:[%s3963_s21 + $0x10] sm:$0xff]  ;;  %p3800_p13 = pneg %p3799_p12 }
  0x20   : > { %3690 = vmatpush.bf16.msra.mxu1 %v3383_v3  ;;  %681 = vmatpush.bf16.msra.mxu0 %v3383_v3  ;;  %v576_v31 = vor.u32 %v574_v29, %v572_v25  ;;  %v584_v38 = vor.u32 %v582_v36, %v580_v32  ;;  %v596_v46 = vrot.slane %v594_v44, 1  ;;  %v490_v54 = vshll.u32 %v3356_v50, 16 }
  0x21   : > { %v565_v17 = vsel %vm481_vm0, %v560_v14, %v564_v15  ;;  %v573_v26 = vsel %vm481_vm0, %v568_v24, %v572_v25  ;;  %v592_v45 = vor.u32 %v590_v43, %v588_v39  ;;  %v487_v55 = vrot.slane %v485_v53, 1  ;;  %v3359_v24 = vld [vmem:[%s3963_s21 + $0x20] sm:$0xff]  ;;  %p3805_p3 = pnand %p3804_p2, %p3800_p13 }
  0x22   : > { %v581_v33 = vsel %vm481_vm0, %v576_v31, %v580_v32  ;;  %v589_v40 = vsel %vm481_vm0, %v584_v38, %v588_v39  ;;  %v492_v56 = vrot.slane %v490_v54, 1  ;;  %v598_v57 = vshrl.u32 %v4030_v42, 16  ;;  %v3360_v32 = vld [vmem:[%s3963_s21 + $0x28] sm:$0xff] }
  0x23   : > { %v597_v47 = vsel %vm481_vm0, %v592_v45, %v596_v46  ;;  %v602_v58 = vshll.u32 %v4041_v51, 16  ;;  %v488_v59 = vor.u32 %v487_v55, %v483_v52  ;;  %v463_v1 = vunpack.c.l.b16 %v380_v63 }
  0x24   : > { %3691 = vmatpush.bf16.msra.mxu1 %v3382_v4  ;;  %682 = vmatpush.bf16.msra.mxu0 %v3382_v4  ;;  %v600_v61 = vor.u32 %v598_v57, %v596_v46  ;;  %v494_v3 = vshrl.u32 %v3356_v50, 16  ;;  %v498_v8 = vshll.u32 %v3357_v2, 16  ;;  %v606_v11 = vshrl.u32 %v4041_v51, 16 }
  0x25   : > { %v493_v60 = vsel %vm481_vm0, %v488_v59, %v492_v56  ;;  %v604_v62 = vrot.slane %v602_v58, 1  ;;  %v480_v4 = vpack.c.b16 %v463_v1, %v463_v1  ;;  %v526_v43 = vshrl.u32 %v3360_v32, 16  ;;  %v3363_v59 = vld [vmem:[%s3963_s21 + $0x40] sm:$0xff] }
  0x27   : > { %v605_v0 = vsel %vm481_vm0, %v600_v61, %v604_v62  ;;  %v610_v12 = vshll.u32 %v480_v4, 16  ;;  %v608_v14 = vor.u32 %v606_v11, %v604_v62  ;;  %v546_v61 = vshll.u32 %v3363_v59, 16 }
  0x28   : > { %3692 = vmatpush.bf16.msra.mxu1 %v3381_v6  ;;  %683 = vmatpush.bf16.msra.mxu0 %v3381_v6  ;;  %v496_v6 = vor.u32 %v494_v3, %v492_v56  ;;  %v550_v3 = vshrl.u32 %v3363_v59, 16 }
  0x29   : > { %v612_v15 = vrot.slane %v610_v12, 1 }
  0x2c   : > { %3693 = vmatpush.bf16.msra.mxu1 %v3380_v9  ;;  %684 = vmatpush.bf16.msra.mxu0 %v3380_v9  ;;  %v500_v9 = vrot.slane %v498_v8, 1 }
  0x30   : > { %3694 = vmatpush.bf16.msra.mxu1 %v3379_v13  ;;  %685 = vmatpush.bf16.msra.mxu0 %v3379_v13  ;;  %v501_v13 = vsel %vm481_vm0, %v496_v6, %v500_v9 }
  0x33   : > { %731 = vmatmul.bf16.vlgmr.msra.gmra.mxu1 %v565_v17  ;;  %686 = vmatmul.bf16.vlgmr.msra.gmra.mxu0 %v493_v60  ;;  %v3358_v17 = vld [vmem:[%s3963_s21 + $0x18] sm:$0xff] }
  0x34   : > { %831 = vmatpush.bf16.msrb.mxu1 %v3378_v16  ;;  %v613_v16 = vsel %vm481_vm0, %v608_v14, %v612_v15  ;;  %v510_v25 = vshrl.u32 %v3358_v17, 16  ;;  %v3400_v14 = vld [vmem:[%s4949_s3 + $0x68] sm:$0xff]  ;;  %v3399_v15 = vld [vmem:[%s4949_s3 + $0x60] sm:$0xff] }
  0x38   : > { %832 = vmatpush.bf16.msrb.mxu1 %v3377_v18  ;;  %v502_v18 = vshrl.u32 %v3357_v2, 16 }
  0x3a   : > { %v504_v21 = vor.u32 %v502_v18, %v500_v9  ;;  %v3402_v9 = vld [vmem:[%s4949_s3 + $0x78] sm:$0xff] }
  0x3b   : > { %1264 = vmatpush.bf16.msra.mxu2 %v3402_v9  ;;  %v3398_v18 = vld [vmem:[%s4949_s3 + $0x58] sm:$0xff] }
  0x3c   : > { %833 = vmatpush.bf16.msrb.mxu1 %v3376_v20  ;;  %v506_v20 = vshll.u32 %v3358_v17, 16 }
  0x3e   : > { %v508_v22 = vrot.slane %v506_v20, 1 }
  0x40   : > { %834 = vmatpush.bf16.msrb.mxu1 %v3375_v23  ;;  %v509_v23 = vsel %vm481_vm0, %v504_v21, %v508_v22  ;;  %v3397_v21 = vld [vmem:[%s4949_s3 + $0x50] sm:$0xff] }
  0x43   : > { %736 = vmatmul.bf16.gmra.mxu1 %v573_v26  ;;  %691 = vmatmul.bf16.gmra.mxu0 %v501_v13  ;;  %v514_v26 = vshll.u32 %v3359_v24, 16  ;;  %v3401_v13 = vld [vmem:[%s4949_s3 + $0x70] sm:$0xff] }
  0x44   : > { %835 = vmatpush.bf16.msrb.mxu1 %v3374_v27  ;;  %v512_v27 = vor.u32 %v510_v25, %v508_v22  ;;  %1265 = vmatpush.bf16.msra.mxu2 %v3401_v13 }
  0x45   : > { %v516_v29 = vrot.slane %v514_v26, 1  ;;  %v3395_v26 = vld [vmem:[%s4949_s3 + $0x40] sm:$0xff] }
  0x47   : > { %v517_v30 = vsel %vm481_vm0, %v512_v27, %v516_v29  ;;  %v3425_v27 = vld [vmem:[%s4949_s3 + $0xb0] sm:$0xff] }
  0x48   : > { %836 = vmatpush.bf16.msrb.mxu1 %v3373_v34  ;;  %v522_v34 = vshll.u32 %v3360_v32, 16  ;;  %1266 = vmatpush.bf16.msra.mxu2 %v3400_v14 }
  0x4a   : > { %v524_v38 = vrot.slane %v522_v34, 1 }
  0x4c   : > { %837 = vmatpush.bf16.msrb.mxu1 %v3372_v41  ;;  %v3361_v41 = vld [vmem:[%s3963_s21 + $0x30] sm:$0xff]  ;;  %v528_v46 = vor.u32 %v526_v43, %v524_v38  ;;  %1267 = vmatpush.bf16.msra.mxu2 %v3399_v15 }
  0x4d   : > { %v530_v44 = vshll.u32 %v3361_v41, 16  ;;  %v534_v52 = vshrl.u32 %v3361_v41, 16 }
  0x50   : > { %838 = vmatpush.bf16.msrb.mxu1 %v3371_v49  ;;  %1268 = vmatpush.bf16.msra.mxu2 %v3398_v18 }
  0x53   : > { %741 = vmatmul.bf16.gmra.mxu1 %v581_v33  ;;  %696 = vmatmul.bf16.gmra.mxu0 %v509_v23  ;;  %v518_v33 = vshrl.u32 %v3359_v24, 16  ;;  %v3396_v23 = vld [vmem:[%s4949_s3 + $0x48] sm:$0xff] }
  0x54   : > { %1269 = vmatpush.bf16.msra.mxu2 %v3397_v21 }
  0x55   : > { %v520_v37 = vor.u32 %v518_v33, %v516_v29 }
  0x57   : > { %v525_v39 = vsel %vm481_vm0, %v520_v37, %v524_v38  ;;  %v3423_v37 = vld [vmem:[%s4949_s3 + $0xa0] sm:$0xff] }
  0x58   : > { %1270 = vmatpush.bf16.msra.mxu2 %v3396_v23 }
  0x5c   : > { %1271 = vmatpush.bf16.msra.mxu2 %v3395_v26 }
  0x63   : > { %746 = vmatmul.bf16.gmra.mxu1 %v589_v40  ;;  %701 = vmatmul.bf16.gmra.mxu0 %v517_v30  ;;  %v3424_v30 = vld [vmem:[%s4949_s3 + $0xa8] sm:$0xff] }
  0x73   : > { %751 = vmatmul.bf16.gmra.mxu1 %v597_v47  ;;  %706 = vmatmul.bf16.gmra.mxu0 %v525_v39  ;;  %v532_v47 = vrot.slane %v530_v44, 1 }
  0x75   : > { %v536_v55 = vor.u32 %v534_v52, %v532_v47 }
  0x83   : > { %756 = vmatmul.bf16.gmra.mxu1 %v605_v0  ;;  %v548_v0 = vrot.slane %v546_v61, 1 }
  0x85   : > { %v552_v6 = vor.u32 %v550_v3, %v548_v0 }
  0x87   : > { %v557_v8 = vsel %vm481_vm0, %v552_v6, %v3981_v10 }
  0x93   : > { %761 = vmatmul.bf16.gmra.mxu1 %v613_v16  ;;  %v3845_v16 = vmov 0  }
  0x94   : > { %988 = vst [vmem:[#allocation2] sm:$0x8] %v3845_v16 }
  0x95   : > { %1053 = vst [vmem:[#allocation2 + $0x84] sm:$0x1] %v3845_v16 }
  0xa3   : > { %839 = vmatmul.bf16.vlgmr.msrb.gmra.mxu1 %v3355_v48  ;;  %v533_v48 = vsel %vm481_vm0, %v528_v46, %v532_v47  ;;  %v3394_v47 = vld [vmem:[%s4949_s3 + $0x38] sm:$0xff] }
  0xa4   : > { %711 = vmatmul.bf16.gmra.mxu0 %v533_v48  ;;  %v3421_v48 = vld [vmem:[%s4949_s3 + $0x90] sm:$0xff]  ;;  %1589 = vmatpush.bf16.msrb.mxu2 %v3394_v47 }
  0xa5   : > { %3695 = vmatpush.bf16.msra.mxu3 %v3394_v47 }
  0xb0   : > { %v4056_v31 = vpop.f32.mrf.mxu1  ;;  %v687_v12 = vpop.f32.mrf.mxu0 }
  0xb3   : > { %844 = vmatmul.bf16.gmra.mxu1 %v3356_v50  ;;  %v3362_v50 = vld [vmem:[%s3963_s21 + $0x38] sm:$0xff] }
  0xb4   : > { %v538_v53 = vshll.u32 %v3362_v50, 16  ;;  %v542_v60 = vshrl.u32 %v3362_v50, 16 }
  0xb6   : > { %v540_v56 = vrot.slane %v538_v53, 1  ;;  %v3420_v53 = vld [vmem:[%s4949_s3 + $0x88] sm:$0xff] }
  0xb8   : > { %v4059_v36 = vpop.f32.mrf.mxu1  ;;  %v541_v57 = vsel %vm481_vm0, %v536_v55, %v540_v56  ;;  %v544_v63 = vor.u32 %v542_v60, %v540_v56 }
  0xb9   : > { %716 = vmatmul.bf16.gmra.mxu0 %v541_v57 }
  0xba   : > { %v549_v1 = vsel %vm481_vm0, %v544_v63, %v548_v0  ;;  %v3419_v0 = vld [vmem:[%s4949_s3 + $0x80] sm:$0xff] }
  0xc0   : > { %v4062_v40 = vpop.f32.mrf.mxu1 }
  0xc3   : > { %849 = vmatmul.bf16.gmra.mxu1 %v3357_v2 }
  0xc8   : > { %v4065_v45 = vpop.f32.mrf.mxu1 }
  0xc9   : > { %721 = vmatmul.bf16.gmra.mxu0 %v549_v1 }
  0xd0   : > { %v4068_v49 = vpop.f32.mrf.mxu1 }
  0xd3   : > { %854 = vmatmul.bf16.gmra.mxu1 %v3358_v17  ;;  %v689_v17 = vpop.f32.mrf.mxu0 }
  0xd8   : > { %v4071_v54 = vpop.f32.mrf.mxu1 }
  0xd9   : > { %726 = vmatmul.bf16.gmra.mxu0 %v557_v8 }
  0xdb   : > { %v692_v22 = vpop.f32.mrf.mxu0 }
  0xe0   : > { %v4074_v58 = vpop.f32.mrf.mxu1 }
  0xe3   : > { %859 = vmatmul.bf16.gmra.mxu1 %v3359_v24  ;;  %v3426_v24 = vld [vmem:[%s4949_s3 + $0xb8] sm:$0xff]  ;;  %v694_v29 = vpop.f32.mrf.mxu0 }
  0xe4   : > { %2007 = vmatpush.bf16.msrb.mxu0 %v3426_v24 }
  0xe8   : > { %v4077_v62 = vpop.f32.mrf.mxu1  ;;  %2008 = vmatpush.bf16.msrb.mxu0 %v3425_v27 }
  0xeb   : > { %v697_v46 = vpop.f32.mrf.mxu0 }
  0xec   : > { %2009 = vmatpush.bf16.msrb.mxu0 %v3424_v30 }
  0xf0   : > { %v4080_v2 = vpop.f32.mrf.mxu1  ;;  %2010 = vmatpush.bf16.msrb.mxu0 %v3423_v37 }
  0xf3   : > { %864 = vmatmul.bf16.gmra.mxu1 %v3360_v32  ;;  %v4130_v32 = vld [vmem:[%s4948_s2] ss:$0 sm:$0xff]  ;;  %v699_v63 = vpop.f32.mrf.mxu0 }
  0xf8   : > { %v4082_v4 = vpop.f32.mrf.mxu1 }
  0xfb   : > { %v702_v26 = vpop.f32.mrf.mxu0 }
 0x100   : > { %v4089_v11 = vpop.f32.mrf.mxu1 }
 0x103   : > { %869 = vmatmul.bf16.gmra.mxu1 %v3361_v41  ;;  %v3422_v41 = vld [vmem:[%s4949_s3 + $0x98] sm:$0xff] }
 0x104   : > { %2011 = vmatpush.bf16.msrb.mxu0 %v3422_v41 }
 0x108   : > { %v4097_v10 = vpop.f32.mrf.mxu1  ;;  %2012 = vmatpush.bf16.msrb.mxu0 %v3421_v48 }
 0x10c   : > { %2013 = vmatpush.bf16.msrb.mxu0 %v3420_v53 }
 0x110   : > { %v4105_v20 = vpop.f32.mrf.mxu1  ;;  %2014 = vmatpush.bf16.msrb.mxu0 %v3419_v0 }
 0x113   : > { %874 = vmatmul.bf16.gmra.mxu1 %v3362_v50  ;;  %v1054_v50 = vld [vmem:[#allocation2] sm:$0x8] }
 0x114   : > { %v1354_v55 = vunpack.c.l.b16 %v1054_v50  ;;  %v3393_v50 = vld [vmem:[%s4949_s3 + $0x30] sm:$0xff] }
 0x115   : > { %1590 = vmatpush.bf16.msrb.mxu2 %v3393_v50  ;;  %3696 = vmatpush.bf16.msra.mxu3 %v3393_v50 }
 0x118   : > { %v4116_v25 = vpop.f32.mrf.mxu1 }
 0x120   : > { %v840_v33 = vpop.f32.mrf.mxu1 }
 0x121   : > { %v841_v34 = vadd.f32 %v840_v33, %v687_v12 }
 0x123   : > { %v924_v38 = vadd.f32 %v4130_v32, %v841_v34  ;;  %879 = vmatmul.bf16.gmra.mxu1 %v3363_v59 }
 0x125   : > { %v956_v39 = vmax.f32 %v924_v38, 0.0 }
 0x127   : > { %v989_v43 = vpack.c.bf16 %v956_v39, %v956_v39 }
 0x128   : > { %v842_v44 = vpop.f32.mrf.mxu1 }
 0x129   : > { %1021 = vst [vmem:[#allocation2 + $0x4] sm:$0xf] %v989_v43  ;;  %v843_v52 = vadd.f32 %v842_v44, %v689_v17  ;;  %v704_v44 = vpop.f32.mrf.mxu0 }
 0x12b   : > { %v925_v59 = vadd.f32 %v4130_v32, %v843_v52 }
 0x12d   : > { %v957_v6 = vmax.f32 %v925_v59, 0.0 }
 0x130   : > { %v845_v56 = vpop.f32.mrf.mxu1  ;;  %v1055_v57 = vld [vmem:[#allocation2 + $0x4] sm:$0xf] }
 0x131   : > { %v846_v60 = vadd.f32 %v845_v56, %v692_v22  ;;  %v1152_v61 = vunpack.c.l.b16 %v1055_v57 }
 0x133   : > { %v926_v1 = vadd.f32 %v4130_v32, %v846_v60  ;;  %884 = vmatmul.bf16.gmra.mxu1 %v3969_v5  ;;  %v1355_v3 = vpack.c.b16 %v1152_v61, %v1354_v55 }
 0x135   : > { %v958_v8 = vmax.f32 %v926_v1, 0.0  ;;  %v1374_v9 = vshrl.u32 %v1355_v3, 16  ;;  %v1377_v12 = vshll.u32 %v1355_v3, 16 }
 0x137   : > { %v3455_v13 = vpack.c.bf16 %v958_v8, %v957_v6  ;;  %v1376_v15 = vrot.slane %v1374_v9, 3  ;;  %v1379_v17 = vrot.slane %v1377_v12, 4 }
 0x138   : > { %v847_v14 = vpop.f32.mrf.mxu1 }
 0x139   : > { %3587 = vst [vmem:[#allocation2 + $0x8] sm:$0xff] %v3455_v13   ;;  %v3529_v16 = vunpack.c.l.b16 %v3455_v13  ;;  %v1382_v18 = vshrl.u32 %v3455_v13, 16  ;;  %v1385_v21 = vshll.u32 %v3455_v13, 16  ;;  %v848_v5 = vadd.f32 %v847_v14, %v694_v29 }
 0x13a   : > { %v1380_v27 = vor.u32 %v1379_v17, %v1376_v15 }
 0x13b   : > { %v1184_v22 = vpack.c.b16 %v3529_v16, %v1152_v61  ;;  %v1384_v23 = vrot.slane %v1382_v18, 3  ;;  %v1387_v24 = vrot.slane %v1385_v21, 4  ;;  %v927_v37 = vadd.f32 %v4130_v32, %v848_v5 }
 0x13d   : > { %1272 = vmatmul.bf16.vlgmr.msra.gmra.mxu2 %v1184_v22  ;;  %v4154_v30 = vor.u32 %v1387_v24, %v1384_v23  ;;  %v959_v41 = vmax.f32 %v927_v37, 0.0 }
 0x13f   : > { %v4158_v33 = vsel %vm1372_vm1, %v1380_v27, %v4154_v30 }
 0x140   : > { %v850_v34 = vpop.f32.mrf.mxu1  ;;  %v3403_v48 = vld [vmem:[#allocation2 + $0x4] sm:$0xff] }
 0x141   : > { %v851_v38 = vadd.f32 %v850_v34, %v697_v46  ;;  %v1814_v52 = vshll.u32 %v3403_v48, 16  ;;  %v1812_v61 = vshrl.u32 %v3403_v48, 16 }
 0x143   : > { %v928_v39 = vadd.f32 %v4130_v32, %v851_v38  ;;  %889 = vmatmul.bf16.gmra.mxu1 %v3975_v7  ;;  %v1816_v57 = vrot.slane %v1814_v52, 1  ;;  %v707_v7 = vpop.f32.mrf.mxu0 }
 0x145   : > { %v960_v43 = vmax.f32 %v928_v39, 0.0  ;;  %v1817_v3 = vor.u32 %v1816_v57, %v1812_v61 }
 0x147   : > { %v3460_v29 = vpack.c.bf16 %v960_v43, %v959_v41  ;;  %v3392_v43 = vld [vmem:[%s4949_s3 + $0x28] sm:$0xff] }
 0x148   : > { %v852_v47 = vpop.f32.mrf.mxu1  ;;  %1591 = vmatpush.bf16.msrb.mxu2 %v3392_v43  ;;  %3697 = vmatpush.bf16.msra.mxu3 %v3392_v43 }
 0x149   : > { %3588 = vst [vmem:[#allocation2 + $0x10] sm:$0xff] %v3460_v29   ;;  %v853_v53 = vadd.f32 %v852_v47, %v699_v63 }
 0x14b   : > { %v929_v59 = vadd.f32 %v4130_v32, %v853_v53  ;;  %v709_v14 = vpop.f32.mrf.mxu0 }
 0x14d   : > { %v961_v8 = vmax.f32 %v929_v59, 0.0 }
 0x150   : > { %v855_v46 = vpop.f32.mrf.mxu1  ;;  %v3705_v55 = vld [vmem:[#allocation2 + $0xc] sm:$0xff]  }
 0x151   : > { %v3404_v56 = vld [vmem:[#allocation2 + $0xc] sm:$0xff]  ;;  %v856_v60 = vadd.f32 %v855_v46, %v702_v26  ;;  %1277 = vmatmul.bf16.gmra.mxu2 %v3705_v55 }
 0x152   : > { %v1819_v0 = vshll.u32 %v3404_v56, 16 }
 0x153   : > { %v930_v1 = vadd.f32 %v4130_v32, %v856_v60  ;;  %894 = vmatmul.bf16.gmra.mxu1 %v3997_v19  ;;  %v1823_v19 = vshrl.u32 %v3404_v56, 16  ;;  %v712_v27 = vpop.f32.mrf.mxu0 }
 0x154   : > { %v1821_v6 = vrot.slane %v1819_v0, 1 }
 0x155   : > { %v962_v9 = vmax.f32 %v930_v1, 0.0 }
 0x156   : > { %v1822_v63 = vsel %vm481_vm0, %v1817_v3, %v1821_v6  ;;  %v1825_v26 = vor.u32 %v1823_v19, %v1821_v6  ;;  %v3391_v3 = vld [vmem:[%s4949_s3 + $0x20] sm:$0xff] }
 0x157   : > { %v3465_v12 = vpack.c.bf16 %v962_v9, %v961_v8  ;;  %2015 = vmatmul.bf16.vlgmr.msrb.gmra.mxu0 %v1822_v63  ;;  %1592 = vmatpush.bf16.msrb.mxu2 %v3391_v3 }
 0x158   : > { %v857_v13 = vpop.f32.mrf.mxu1  ;;  %3698 = vmatpush.bf16.msra.mxu3 %v3391_v3 }
 0x159   : > { %3589 = vst [vmem:[#allocation2 + $0x18] sm:$0xff] %v3465_v12   ;;  %v858_v15 = vadd.f32 %v857_v13, %v704_v44 }
 0x15b   : > { %v931_v21 = vadd.f32 %v4130_v32, %v858_v15  ;;  %v714_v29 = vpop.f32.mrf.mxu0 }
 0x15d   : > { %v963_v34 = vmax.f32 %v931_v21, 0.0 }
 0x160   : > { %v860_v16 = vpop.f32.mrf.mxu1  ;;  %v3707_v17 = vld [vmem:[#allocation2 + $0x14] sm:$0xff]  }
 0x161   : > { %v3405_v18 = vld [vmem:[#allocation2 + $0x14] sm:$0xff]  ;;  %v861_v22 = vadd.f32 %v860_v16, %v707_v7  ;;  %1282 = vmatmul.bf16.gmra.mxu2 %v3707_v17 }
 0x162   : > { %v1827_v23 = vshll.u32 %v3405_v18, 16  ;;  %v1831_v53 = vshrl.u32 %v3405_v18, 16  ;;  %v3389_v18 = vld [vmem:[%s4949_s3 + $0x10] sm:$0xff] }
 0x163   : > { %v932_v24 = vadd.f32 %v4130_v32, %v861_v22  ;;  %899 = vmatmul.bf16.gmra.mxu1 %v4012_v28  ;;  %v717_v1 = vpop.f32.mrf.mxu0 }
 0x164   : > { %v1829_v5 = vrot.slane %v1827_v23, 1 }
 0x165   : > { %v964_v37 = vmax.f32 %v932_v24, 0.0 }
 0x166   : > { %v1830_v38 = vsel %vm481_vm0, %v1825_v26, %v1829_v5  ;;  %v1833_v56 = vor.u32 %v1831_v53, %v1829_v5  ;;  %v3388_v5 = vld [vmem:[%s4949_s3 + $0x8] sm:$0xff] }
 0x167   : > { %v3470_v39 = vpack.c.bf16 %v964_v37, %v963_v34  ;;  %2020 = vmatmul.bf16.gmra.mxu0 %v1830_v38 }
 0x168   : > { %v862_v41 = vpop.f32.mrf.mxu1 }
 0x169   : > { %3590 = vst [vmem:[#allocation2 + $0x20] sm:$0xff] %v3470_v39   ;;  %v863_v44 = vadd.f32 %v862_v41, %v709_v14 }
 0x16b   : > { %v933_v50 = vadd.f32 %v4130_v32, %v863_v44  ;;  %v719_v14 = vpop.f32.mrf.mxu0 }
 0x16d   : > { %v965_v7 = vmax.f32 %v933_v50, 0.0 }
 0x170   : > { %v865_v28 = vpop.f32.mrf.mxu1  ;;  %v3709_v47 = vld [vmem:[#allocation2 + $0x1c] sm:$0xff]  }
 0x171   : > { %v3406_v48 = vld [vmem:[#allocation2 + $0x1c] sm:$0xff]  ;;  %v866_v52 = vadd.f32 %v865_v28, %v712_v27  ;;  %1287 = vmatmul.bf16.gmra.mxu2 %v3709_v47 }
 0x172   : > { %v1835_v46 = vshll.u32 %v3406_v48, 16  ;;  %v1839_v15 = vshrl.u32 %v3406_v48, 16 }
 0x173   : > { %v934_v55 = vadd.f32 %v4130_v32, %v866_v52  ;;  %904 = vmatmul.bf16.gmra.mxu1 %v4021_v35  ;;  %v3390_v35 = vld [vmem:[%s4949_s3 + $0x18] sm:$0xff]  ;;  %v722_v34 = vpop.f32.mrf.mxu0 }
 0x174   : > { %v1837_v57 = vrot.slane %v1835_v46, 1  ;;  %3699 = vmatpush.bf16.msra.mxu3 %v3390_v35  ;;  %1593 = vmatpush.bf16.msrb.mxu2 %v3390_v35 }
 0x175   : > { %v966_v59 = vmax.f32 %v934_v55, 0.0 }
 0x176   : > { %v1838_v60 = vsel %vm481_vm0, %v1833_v56, %v1837_v57  ;;  %v1841_v21 = vor.u32 %v1839_v15, %v1837_v57 }
 0x177   : > { %v3475_v61 = vpack.c.bf16 %v966_v59, %v965_v7  ;;  %2025 = vmatmul.bf16.gmra.mxu0 %v1838_v60 }
 0x178   : > { %v867_v0 = vpop.f32.mrf.mxu1  ;;  %3700 = vmatpush.bf16.msra.mxu3 %v3389_v18  ;;  %1594 = vmatpush.bf16.msrb.mxu2 %v3389_v18 }
 0x179   : > { %3591 = vst [vmem:[#allocation2 + $0x28] sm:$0xff] %v3475_v61   ;;  %v868_v6 = vadd.f32 %v867_v0, %v714_v29 }
 0x17b   : > { %v935_v12 = vadd.f32 %v4130_v32, %v868_v6  ;;  %v724_v46 = vpop.f32.mrf.mxu0 }
 0x17c   : > { %3701 = vmatpush.bf16.msra.mxu3 %v3388_v5  ;;  %1595 = vmatpush.bf16.msrb.mxu2 %v3388_v5 }
 0x17d   : > { %v967_v19 = vmax.f32 %v935_v12, 0.0 }
 0x180   : > { %v870_v8 = vpop.f32.mrf.mxu1  ;;  %v3711_v9 = vld [vmem:[#allocation2 + $0x24] sm:$0xff]  }
 0x181   : > { %v3407_v63 = vld [vmem:[#allocation2 + $0x24] sm:$0xff]  ;;  %v871_v13 = vadd.f32 %v870_v8, %v717_v1  ;;  %1292 = vmatmul.bf16.gmra.mxu2 %v3711_v9 }
 0x182   : > { %v1843_v16 = vshll.u32 %v3407_v63, 16  ;;  %v1847_v29 = vshrl.u32 %v3407_v63, 16 }
 0x183   : > { %v936_v17 = vadd.f32 %v4130_v32, %v871_v13  ;;  %909 = vmatmul.bf16.gmra.mxu1 %v4030_v42  ;;  %v3387_v42 = vld [vmem:[%s4949_s3] sm:$0xff]  ;;  %v727_v59 = vpop.f32.mrf.mxu0 }
 0x184   : > { %v1845_v22 = vrot.slane %v1843_v16, 1  ;;  %3702 = vmatpush.bf16.msra.mxu3 %v3387_v42  ;;  %1596 = vmatpush.bf16.msrb.mxu2 %v3387_v42 }
 0x185   : > { %v968_v23 = vmax.f32 %v936_v17, 0.0 }
 0x186   : > { %v1846_v24 = vsel %vm481_vm0, %v1841_v21, %v1845_v22  ;;  %v1849_v48 = vor.u32 %v1847_v29, %v1845_v22 }
 0x187   : > { %v3480_v26 = vpack.c.bf16 %v968_v23, %v967_v19  ;;  %2030 = vmatmul.bf16.gmra.mxu0 %v1846_v24 }
 0x188   : > { %v872_v27 = vpop.f32.mrf.mxu1 }
 0x189   : > { %3592 = vst [vmem:[#allocation2 + $0x30] sm:$0xff] %v3480_v26   ;;  %v873_v37 = vadd.f32 %v872_v27, %v719_v14 }
 0x18b   : > { %v937_v43 = vadd.f32 %v4130_v32, %v873_v37  ;;  %v729_v26 = vpop.f32.mrf.mxu0 }
 0x18d   : > { %v969_v52 = vmax.f32 %v937_v43, 0.0 }
 0x190   : > { %v875_v38 = vpop.f32.mrf.mxu1  ;;  %v3713_v39 = vld [vmem:[#allocation2 + $0x2c] sm:$0xff]  }
 0x191   : > { %v3408_v41 = vld [vmem:[#allocation2 + $0x2c] sm:$0xff]  ;;  %v876_v44 = vadd.f32 %v875_v38, %v722_v34  ;;  %1297 = vmatmul.bf16.gmra.mxu2 %v3713_v39 }
 0x192   : > { %v1851_v28 = vshll.u32 %v3408_v41, 16 }
 0x193   : > { %v938_v47 = vadd.f32 %v4130_v32, %v876_v44  ;;  %914 = vmatmul.bf16.gmra.mxu1 %v4041_v51  ;;  %v1855_v51 = vshrl.u32 %v3408_v41, 16 }
 0x194   : > { %v1853_v50 = vrot.slane %v1851_v28, 1 }
 0x195   : > { %v970_v53 = vmax.f32 %v938_v47, 0.0 }
 0x196   : > { %v1854_v55 = vsel %vm481_vm0, %v1849_v48, %v1853_v50  ;;  %v1857_v8 = vor.u32 %v1855_v51, %v1853_v50 }
 0x197   : > { %v3485_v56 = vpack.c.bf16 %v970_v53, %v969_v52  ;;  %2035 = vmatmul.bf16.gmra.mxu0 %v1854_v55 }
 0x198   : > { %v877_v57 = vpop.f32.mrf.mxu1 }
 0x199   : > { %3593 = vst [vmem:[#allocation2 + $0x38] sm:$0xff] %v3485_v56   ;;  %v878_v7 = vadd.f32 %v877_v57, %v724_v46  ;;  %v1436_v13 = vshrl.u32 %v3485_v56, 16  ;;  %v1439_v14 = vshll.u32 %v3485_v56, 16 }
 0x19b   : > { %v939_v1 = vadd.f32 %v4130_v32, %v878_v7  ;;  %v1438_v18 = vrot.slane %v1436_v13, 3  ;;  %v1441_v21 = vrot.slane %v1439_v14, 4 }
 0x19d   : > { %v971_v63 = vmax.f32 %v939_v1, 0.0  ;;  %v4207_v27 = vor.u32 %v1441_v21, %v1438_v18 }
 0x1a0   : > { %v880_v60 = vpop.f32.mrf.mxu1  ;;  %v3715_v61 = vld [vmem:[#allocation2 + $0x34] sm:$0xff]  }
 0x1a1   : > { %v3409_v0 = vld [vmem:[#allocation2 + $0x34] sm:$0xff]  ;;  %v881_v3 = vadd.f32 %v880_v60, %v727_v59  ;;  %1302 = vmatmul.bf16.gmra.mxu2 %v3715_v61 }
 0x1a2   : > { %v1859_v6 = vshll.u32 %v3409_v0, 16  ;;  %v1863_v44 = vshrl.u32 %v3409_v0, 16 }
 0x1a3   : > { %v940_v35 = vadd.f32 %v4130_v32, %v881_v3 }
 0x1a4   : > { %v1861_v9 = vrot.slane %v1859_v6, 1 }
 0x1a5   : > { %v972_v12 = vmax.f32 %v940_v35, 0.0 }
 0x1a6   : > { %v1862_v15 = vsel %vm481_vm0, %v1857_v8, %v1861_v9  ;;  %v1865_v47 = vor.u32 %v1863_v44, %v1861_v9 }
 0x1a7   : > { %v3490_v16 = vpack.c.bf16 %v972_v12, %v971_v63  ;;  %2040 = vmatmul.bf16.gmra.mxu0 %v1862_v15 }
 0x1a8   : > { %v882_v17 = vpop.f32.mrf.mxu1 }
 0x1a9   : > { %3594 = vst [vmem:[#allocation2 + $0x40] sm:$0xff] %v3490_v16   ;;  %v1445_v22 = vshrl.u32 %v3490_v16, 16  ;;  %v1448_v19 = vshll.u32 %v3490_v16, 16  ;;  %v883_v5 = vadd.f32 %v882_v17, %v729_v26 }
 0x1ab   : > { %v1447_v23 = vrot.slane %v1445_v22, 3  ;;  %v1450_v24 = vrot.slane %v1448_v19, 4  ;;  %v941_v41 = vadd.f32 %v4130_v32, %v883_v5 }
 0x1ad   : > { %v1451_v42 = vor.u32 %v1450_v24, %v1447_v23  ;;  %v973_v50 = vmax.f32 %v941_v41, 0.0 }
 0x1af   : > { %v1452_v34 = vsel %vm1372_vm1, %v4207_v27, %v1451_v42 }
 0x1b0   : > { %v885_v37 = vpop.f32.mrf.mxu1  ;;  %v3717_v38 = vld [vmem:[#allocation2 + $0x3c] sm:$0xff]   ;;  %1632 = vmatmul.bf16.vlgmr.msra.gmra.mxu3 %v1452_v34 }
 0x1b1   : > { %v3410_v39 = vld [vmem:[#allocation2 + $0x3c] sm:$0xff]  ;;  %v886_v43 = vadd.f32 %v885_v37, %v4056_v31  ;;  %1307 = vmatmul.bf16.gmra.mxu2 %v3717_v38 }
 0x1b2   : > { %v1867_v29 = vshll.u32 %v3410_v39, 16  ;;  %v1871_v35 = vshrl.u32 %v3410_v39, 16 }
 0x1b3   : > { %v942_v28 = vadd.f32 %v4130_v32, %v886_v43 }
 0x1b4   : > { %v1869_v48 = vrot.slane %v1867_v29, 1 }
 0x1b5   : > { %v974_v52 = vmax.f32 %v942_v28, 0.0 }
 0x1b6   : > { %v1870_v53 = vsel %vm481_vm0, %v1865_v47, %v1869_v48  ;;  %v1873_v12 = vor.u32 %v1871_v35, %v1869_v48 }
 0x1b7   : > { %v3495_v46 = vpack.c.bf16 %v974_v52, %v973_v50  ;;  %2045 = vmatmul.bf16.gmra.mxu0 %v1870_v53 }
 0x1b8   : > { %v887_v55 = vpop.f32.mrf.mxu1 }
 0x1b9   : > { %3595 = vst [vmem:[#allocation2 + $0x48] sm:$0xff] %v3495_v46   ;;  %v1454_v56 = vshrl.u32 %v3495_v46, 16  ;;  %v1457_v57 = vshll.u32 %v3495_v46, 16  ;;  %v888_v31 = vadd.f32 %v887_v55, %v4059_v36 }
 0x1bb   : > { %v1456_v7 = vrot.slane %v1454_v56, 3  ;;  %v1459_v59 = vrot.slane %v1457_v57, 4  ;;  %v943_v51 = vadd.f32 %v4130_v32, %v888_v31 }
 0x1bd   : > { %v1460_v60 = vor.u32 %v1459_v59, %v1456_v7  ;;  %v975_v13 = vmax.f32 %v943_v51, 0.0 }
 0x1bf   : > { %v1461_v61 = vsel %vm1372_vm1, %v1451_v42, %v1460_v60 }
 0x1c0   : > { %v890_v0 = vpop.f32.mrf.mxu1  ;;  %v3719_v1 = vld [vmem:[#allocation2 + $0x44] sm:$0xff]   ;;  %1637 = vmatmul.bf16.gmra.mxu3 %v1461_v61  ;;  %v4220_v63 = vpop.f32.mrf.mxu2 }
 0x1c1   : > { %v3411_v3 = vld [vmem:[#allocation2 + $0x44] sm:$0xff]  ;;  %v891_v6 = vadd.f32 %v890_v0, %v4062_v40  ;;  %1312 = vmatmul.bf16.gmra.mxu2 %v3719_v1 }
 0x1c2   : > { %v1875_v8 = vshll.u32 %v3411_v3, 16  ;;  %v1879_v39 = vshrl.u32 %v3411_v3, 16 }
 0x1c3   : > { %v944_v9 = vadd.f32 %v4130_v32, %v891_v6 }
 0x1c4   : > { %v1877_v36 = vrot.slane %v1875_v8, 1 }
 0x1c5   : > { %v976_v14 = vmax.f32 %v944_v9, 0.0 }
 0x1c6   : > { %v1878_v15 = vsel %vm481_vm0, %v1873_v12, %v1877_v36 }
 0x1c7   : > { %v3500_v16 = vpack.c.bf16 %v976_v14, %v975_v13  ;;  %2050 = vmatmul.bf16.gmra.mxu0 %v1878_v15 }
 0x1c8   : > { %v892_v17 = vpop.f32.mrf.mxu1  ;;  %v4224_v23 = vpop.f32.mrf.mxu2 }
 0x1c9   : > { %3596 = vst [vmem:[#allocation2 + $0x50] sm:$0xff] %v3500_v16   ;;  %v1463_v18 = vshrl.u32 %v3500_v16, 16  ;;  %v1466_v21 = vshll.u32 %v3500_v16, 16  ;;  %v893_v19 = vadd.f32 %v892_v17, %v4065_v45  ;;  %v1881_v45 = vor.u32 %v1879_v39, %v1877_v36 }
 0x1cb   : > { %v1465_v40 = vrot.slane %v1463_v18, 3  ;;  %v1468_v22 = vrot.slane %v1466_v21, 4  ;;  %v945_v37 = vadd.f32 %v4130_v32, %v893_v19 }
 0x1cd   : > { %v1469_v24 = vor.u32 %v1468_v22, %v1465_v40  ;;  %v977_v28 = vmax.f32 %v945_v37, 0.0 }
 0x1cf   : > { %v1470_v26 = vsel %vm1372_vm1, %v1460_v60, %v1469_v24 }
 0x1d0   : > { %v895_v5 = vpop.f32.mrf.mxu1  ;;  %v3721_v42 = vld [vmem:[#allocation2 + $0x4c] sm:$0xff]   ;;  %1642 = vmatmul.bf16.gmra.mxu3 %v1470_v26 }
 0x1d1   : > { %v3412_v34 = vld [vmem:[#allocation2 + $0x4c] sm:$0xff]  ;;  %v896_v38 = vadd.f32 %v895_v5, %v4068_v49  ;;  %1317 = vmatmul.bf16.gmra.mxu2 %v3721_v42 }
 0x1d2   : > { %v1883_v41 = vshll.u32 %v3412_v34, 16  ;;  %v1887_v6 = vshrl.u32 %v3412_v34, 16 }
 0x1d3   : > { %v946_v43 = vadd.f32 %v4130_v32, %v896_v38 }
 0x1d4   : > { %v4230_v44 = vpop.f32.mrf.mxu0  ;;  %v1885_v29 = vrot.slane %v1883_v41, 1  ;;  %v4232_v48 = vpop.f32.mrf.mxu2 }
 0x1d5   : > { %v978_v47 = vmax.f32 %v946_v43, 0.0 }
 0x1d6   : > { %v1886_v50 = vsel %vm481_vm0, %v1881_v45, %v1885_v29 }
 0x1d7   : > { %v3505_v52 = vpack.c.bf16 %v978_v47, %v977_v28  ;;  %2055 = vmatmul.bf16.gmra.mxu0 %v1886_v50 }
 0x1d8   : > { %v897_v53 = vpop.f32.mrf.mxu1 }
 0x1d9   : > { %3597 = vst [vmem:[#allocation2 + $0x58] sm:$0xff] %v3505_v52   ;;  %v1472_v49 = vshrl.u32 %v3505_v52, 16  ;;  %v1475_v46 = vshll.u32 %v3505_v52, 16  ;;  %v898_v7 = vadd.f32 %v897_v53, %v4071_v54  ;;  %v1889_v54 = vor.u32 %v1887_v6, %v1885_v29 }
 0x1db   : > { %v1474_v55 = vrot.slane %v1472_v49, 3  ;;  %v1477_v56 = vrot.slane %v1475_v46, 4  ;;  %v947_v3 = vadd.f32 %v4130_v32, %v898_v7 }
 0x1dc   : > { %v4235_v57 = vpop.f32.mrf.mxu0  ;;  %v4238_v59 = vpop.f32.mrf.mxu2 }
 0x1dd   : > { %v1478_v31 = vor.u32 %v1477_v56, %v1474_v55  ;;  %v979_v36 = vmax.f32 %v947_v3, 0.0 }
 0x1df   : > { %v1479_v60 = vsel %vm1372_vm1, %v1469_v24, %v1478_v31 }
 0x1e0   : > { %v900_v61 = vpop.f32.mrf.mxu1  ;;  %v3723_v0 = vld [vmem:[#allocation2 + $0x54] sm:$0xff]   ;;  %1647 = vmatmul.bf16.gmra.mxu3 %v1479_v60 }
 0x1e1   : > { %v3413_v1 = vld [vmem:[#allocation2 + $0x54] sm:$0xff]  ;;  %v901_v51 = vadd.f32 %v900_v61, %v4074_v58  ;;  %1322 = vmatmul.bf16.gmra.mxu2 %v3723_v0 }
 0x1e2   : > { %v1891_v35 = vshll.u32 %v3413_v1, 16  ;;  %v1895_v41 = vshrl.u32 %v3413_v1, 16 }
 0x1e3   : > { %v948_v8 = vadd.f32 %v4130_v32, %v901_v51 }
 0x1e4   : > { %v4244_v9 = vpop.f32.mrf.mxu0  ;;  %v1893_v12 = vrot.slane %v1891_v35, 1  ;;  %v4246_v14 = vpop.f32.mrf.mxu2 }
 0x1e5   : > { %v980_v13 = vmax.f32 %v948_v8, 0.0 }
 0x1e6   : > { %v1894_v15 = vsel %vm481_vm0, %v1889_v54, %v1893_v12 }
 0x1e7   : > { %v3510_v16 = vpack.c.bf16 %v980_v13, %v979_v36  ;;  %2060 = vmatmul.bf16.gmra.mxu0 %v1894_v15 }
 0x1e8   : > { %v902_v17 = vpop.f32.mrf.mxu1 }
 0x1e9   : > { %3598 = vst [vmem:[#allocation2 + $0x60] sm:$0xff] %v3510_v16   ;;  %v1481_v58 = vshrl.u32 %v3510_v16, 16  ;;  %v1484_v18 = vshll.u32 %v3510_v16, 16  ;;  %v903_v19 = vadd.f32 %v902_v17, %v4077_v62  ;;  %v1897_v62 = vor.u32 %v1895_v41, %v1893_v12 }
 0x1eb   : > { %v1483_v21 = vrot.slane %v1481_v58, 3  ;;  %v1486_v40 = vrot.slane %v1484_v18, 4  ;;  %v949_v38 = vadd.f32 %v4130_v32, %v903_v19 }
 0x1ec   : > { %v4249_v22 = vpop.f32.mrf.mxu0  ;;  %v4252_v24 = vpop.f32.mrf.mxu2 }
 0x1ed   : > { %v1487_v26 = vor.u32 %v1486_v40, %v1483_v21  ;;  %v981_v47 = vmax.f32 %v949_v38, 0.0 }
 0x1ef   : > { %v1488_v5 = vsel %vm1372_vm1, %v1478_v31, %v1487_v26 }
 0x1f0   : > { %v905_v42 = vpop.f32.mrf.mxu1  ;;  %v3725_v34 = vld [vmem:[#allocation2 + $0x5c] sm:$0xff]   ;;  %1652 = vmatmul.bf16.gmra.mxu3 %v1488_v5 }
 0x1f1   : > { %v3414_v37 = vld [vmem:[#allocation2 + $0x5c] sm:$0xff]  ;;  %v906_v39 = vadd.f32 %v905_v42, %v4080_v2  ;;  %1327 = vmatmul.bf16.gmra.mxu2 %v3725_v34 }
 0x1f2   : > { %v1899_v43 = vshll.u32 %v3414_v37, 16  ;;  %v1903_v54 = vshrl.u32 %v3414_v37, 16 }
 0x1f3   : > { %v950_v45 = vadd.f32 %v4130_v32, %v906_v39 }
 0x1f4   : > { %v4258_v29 = vpop.f32.mrf.mxu0  ;;  %v1901_v28 = vrot.slane %v1899_v43, 1  ;;  %v4260_v52 = vpop.f32.mrf.mxu2 }
 0x1f5   : > { %v982_v50 = vmax.f32 %v950_v45, 0.0 }
 0x1f6   : > { %v1902_v53 = vsel %vm481_vm0, %v1897_v62, %v1901_v28 }
 0x1f7   : > { %v3515_v49 = vpack.c.bf16 %v982_v50, %v981_v47  ;;  %2065 = vmatmul.bf16.gmra.mxu0 %v1902_v53 }
 0x1f8   : > { %v907_v46 = vpop.f32.mrf.mxu1 }
 0x1f9   : > { %3599 = vst [vmem:[#allocation2 + $0x68] sm:$0xff] %v3515_v49   ;;  %v1490_v2 = vshrl.u32 %v3515_v49, 16  ;;  %v1493_v55 = vshll.u32 %v3515_v49, 16  ;;  %v908_v60 = vadd.f32 %v907_v46, %v4082_v4  ;;  %v1905_v4 = vor.u32 %v1903_v54, %v1901_v28 }
 0x1fb   : > { %v1492_v56 = vrot.slane %v1490_v2, 3  ;;  %v1495_v7 = vrot.slane %v1493_v55, 4  ;;  %v951_v35 = vadd.f32 %v4130_v32, %v908_v60 }
 0x1fc   : > { %v4263_v31 = vpop.f32.mrf.mxu0  ;;  %v4266_v61 = vpop.f32.mrf.mxu2 }
 0x1fd   : > { %v1496_v0 = vor.u32 %v1495_v7, %v1492_v56  ;;  %v983_v16 = vmax.f32 %v951_v35, 0.0 }
 0x1ff   : > { %v1497_v1 = vsel %vm1372_vm1, %v1487_v26, %v1496_v0 }
 0x200   : > { %v910_v3 = vpop.f32.mrf.mxu1  ;;  %v3727_v51 = vld [vmem:[#allocation2 + $0x64] sm:$0xff]   ;;  %1657 = vmatmul.bf16.gmra.mxu3 %v1497_v1 }
 0x201   : > { %v3415_v6 = vld [vmem:[#allocation2 + $0x64] sm:$0xff]  ;;  %v911_v8 = vadd.f32 %v910_v3, %v4089_v11  ;;  %1332 = vmatmul.bf16.gmra.mxu2 %v3727_v51 }
 0x202   : > { %v1907_v12 = vshll.u32 %v3415_v6, 16  ;;  %v1911_v47 = vshrl.u32 %v3415_v6, 16 }
 0x203   : > { %v952_v36 = vadd.f32 %v4130_v32, %v911_v8 }
 0x204   : > { %v4272_v13 = vpop.f32.mrf.mxu0  ;;  %v1909_v15 = vrot.slane %v1907_v12, 1  ;;  %v4274_v58 = vpop.f32.mrf.mxu2 }
 0x205   : > { %v984_v17 = vmax.f32 %v952_v36, 0.0 }
 0x206   : > { %v1910_v18 = vsel %vm481_vm0, %v1905_v4, %v1909_v15 }
 0x207   : > { %v3520_v21 = vpack.c.bf16 %v984_v17, %v983_v16  ;;  %2070 = vmatmul.bf16.gmra.mxu0 %v1910_v18 }
 0x208   : > { %v912_v40 = vpop.f32.mrf.mxu1 }
 0x209   : > { %3600 = vst [vmem:[#allocation2 + $0x70] sm:$0xff] %v3520_v21   ;;  %v1499_v11 = vshrl.u32 %v3520_v21, 16  ;;  %v1502_v19 = vshll.u32 %v3520_v21, 16  ;;  %v913_v34 = vadd.f32 %v912_v40, %v4097_v10  ;;  %v1913_v10 = vor.u32 %v1911_v47, %v1909_v15 }
 0x20b   : > { %v1501_v26 = vrot.slane %v1499_v11, 3  ;;  %v1504_v5 = vrot.slane %v1502_v19, 4  ;;  %v953_v62 = vadd.f32 %v4130_v32, %v913_v34 }
 0x20c   : > { %v4277_v42 = vpop.f32.mrf.mxu0  ;;  %v4280_v37 = vpop.f32.mrf.mxu2 }
 0x20d   : > { %v1505_v38 = vor.u32 %v1504_v5, %v1501_v26  ;;  %v985_v2 = vmax.f32 %v953_v62, 0.0 }
 0x20f   : > { %v1506_v39 = vsel %vm1372_vm1, %v1496_v0, %v1505_v38 }
 0x210   : > { %v915_v41 = vpop.f32.mrf.mxu1  ;;  %v3729_v43 = vld [vmem:[#allocation2 + $0x6c] sm:$0xff]   ;;  %1662 = vmatmul.bf16.gmra.mxu3 %v1506_v39 }
 0x211   : > { %v3416_v45 = vld [vmem:[#allocation2 + $0x6c] sm:$0xff]  ;;  %v916_v28 = vadd.f32 %v915_v41, %v4105_v20  ;;  %1337 = vmatmul.bf16.gmra.mxu2 %v3729_v43 }
 0x212   : > { %v1915_v50 = vshll.u32 %v3416_v45, 16 }
 0x213   : > { %v954_v53 = vadd.f32 %v4130_v32, %v916_v28 }
 0x214   : > { %v4286_v49 = vpop.f32.mrf.mxu0  ;;  %v1917_v46 = vrot.slane %v1915_v50, 1  ;;  %v4288_v56 = vpop.f32.mrf.mxu2 }
 0x215   : > { %v986_v55 = vmax.f32 %v954_v53, 0.0 }
 0x216   : > { %v1918_v7 = vsel %vm481_vm0, %v1913_v10, %v1917_v46 }
 0x217   : > { %v3525_v60 = vpack.c.bf16 %v986_v55, %v985_v2  ;;  %2075 = vmatmul.bf16.gmra.mxu0 %v1918_v7 }
 0x218   : > { %v917_v0 = vpop.f32.mrf.mxu1 }
 0x219   : > { %3601 = vst [vmem:[#allocation2 + $0x78] sm:$0xff] %v3525_v60   ;;  %v918_v20 = vadd.f32 %v917_v0, %v4116_v25  ;;  %v1508_v1 = vshrl.u32 %v3525_v60, 16  ;;  %v1511_v3 = vshll.u32 %v3525_v60, 16  ;;  %v1919_v25 = vshrl.u32 %v3416_v45, 16  ;;  %v1710_v0 = vld [vmem:[#allocation2 + $0x84] sm:$0x1] }
 0x21a   : > { %v3586_v62 = vunpack.c.h.b16 %v3525_v60 }
 0x21b   : > { %v955_v51 = vadd.f32 %v4130_v32, %v918_v20  ;;  %v1510_v6 = vrot.slane %v1508_v1, 3  ;;  %v1513_v35 = vrot.slane %v1511_v3, 4  ;;  %v1921_v32 = vor.u32 %v1919_v25, %v1917_v46 }
 0x21c   : > { %v4293_v8 = vpop.f32.mrf.mxu0  ;;  %v4295_v12 = vpop.f32.mrf.mxu2 }
 0x21d   : > { %v987_v54 = vmax.f32 %v955_v51, 0.0  ;;  %v1514_v36 = vor.u32 %v1513_v35, %v1510_v6  ;;  %v1793_v6 = vunpack.c.l.b16 %v1710_v0 }
 0x21f   : > { %v1020_v4 = vpack.c.bf16 %v987_v54, %v987_v54  ;;  %v1515_v15 = vsel %vm1372_vm1, %v1505_v38, %v1514_v36  ;;  %v1810_v35 = vpack.c.b16 %v1793_v6, %v1793_v6 }
 0x220   : > { %v3730_v16 = vld [vmem:[#allocation2 + $0x74] sm:$0xff]   ;;  %1667 = vmatmul.bf16.gmra.mxu3 %v1515_v15 }
 0x221   : > { %v3417_v17 = vld [vmem:[#allocation2 + $0x74] sm:$0xff]  ;;  %1052 = vst [vmem:[#allocation2 + $0x80] sm:$0xf] %v1020_v4  ;;  %1342 = vmatmul.bf16.gmra.mxu2 %v3730_v16  ;;  %v1939_v16 = vshll.u32 %v1810_v35, 16 }
 0x222   : > { %v1923_v18 = vshll.u32 %v3417_v17, 16  ;;  %v1927_v46 = vshrl.u32 %v3417_v17, 16  ;;  %v2216_v35 = vld [vmem:[%s4953_s7 + $0x70] sm:$0xff] }
 0x223   : > { %v1941_v25 = vrot.slane %v1939_v16, 1 }
 0x224   : > { %v4298_v21 = vpop.f32.mrf.mxu0  ;;  %v1925_v40 = vrot.slane %v1923_v18, 1  ;;  %v4300_v11 = vpop.f32.mrf.mxu2  ;;  %v3603_v18 = vld [vmem:[#allocation2 + $0x10] sm:$0xff]  }
 0x226   : > { %v1926_v19 = vsel %vm481_vm0, %v1921_v32, %v1925_v40  ;;  %v1929_v1 = vor.u32 %v1927_v46, %v1925_v40 }
 0x227   : > { %2080 = vmatmul.bf16.gmra.mxu0 %v1926_v19 }
 0x228   : > { %v1086_v26 = vld [vmem:[#allocation2 + $0x80] sm:$0xf] }
 0x229   : > { %v1183_v5 = vunpack.c.l.b16 %v1086_v26  ;;  %v3418_v34 = vld [vmem:[#allocation2 + $0x7c] sm:$0xff] }
 0x22a   : > { %v1931_v28 = vshll.u32 %v3418_v34, 16  ;;  %v1935_v17 = vshrl.u32 %v3418_v34, 16  ;;  %v2217_v34 = vld [vmem:[%s4953_s7 + $0x78] sm:$0xff] }
 0x22b   : > { %v1371_v38 = vpack.c.b16 %v1183_v5, %v1183_v5  ;;  %v1199_v53 = vpack.c.b16 %v1183_v5, %v3586_v62  ;;  %v1391_v5 = vshrl.u32 %v3603_v18, 16  ;;  %2218 = vmatpush.msra.mxu1 %v2217_v34 }
 0x22c   : > { %v4303_v39 = vpop.f32.mrf.mxu0  ;;  %v4305_v41 = vpop.f32.mrf.mxu2  ;;  %v1933_v2 = vrot.slane %v1931_v28, 1 }
 0x22d   : > { %v1517_v43 = vshrl.u32 %v1371_v38, 16  ;;  %v1520_v45 = vshll.u32 %v1371_v38, 16  ;;  %v1394_v38 = vshll.u32 %v3603_v18, 16  ;;  %2219 = vmatpush.msra.mxu1 %v2216_v35 }
 0x22e   : > { %v1934_v51 = vsel %vm481_vm0, %v1929_v1, %v1933_v2 }
 0x22f   : > { %v1519_v47 = vrot.slane %v1517_v43, 3  ;;  %v1522_v50 = vrot.slane %v1520_v45, 4  ;;  %v1396_v62 = vrot.slane %v1394_v38, 4 }
 0x231   : > { %v1523_v10 = vor.u32 %v1522_v50, %v1519_v47  ;;  %1347 = vmatmul.bf16.gmra.mxu2 %v1199_v53 }
 0x233   : > { %v1524_v55 = vsel %vm1372_vm1, %v1514_v36, %v1523_v10  ;;  %v1633_v7 = vpop.f32.mrf.mxu3  ;;  %v1937_v36 = vor.u32 %v1935_v17, %v1933_v2 }
 0x234   : > { %v4308_v20 = vpop.f32.mrf.mxu0  ;;  %1672 = vmatmul.bf16.gmra.mxu3 %v1524_v55  ;;  %v1308_v3 = vpop.f32.mrf.mxu2  ;;  %v3604_v55 = vld [vmem:[#allocation2 + $0x18] sm:$0xff]  }
 0x235   : > { %v1634_v60 = vadd.f32 %v1633_v7, %v1308_v3  ;;  %v1942_v43 = vsel %vm481_vm0, %v1937_v36, %v1941_v25 }
 0x237   : > { %2085 = vmatmul.bf16.gmra.mxu0 %v1934_v51  ;;  %v1400_v51 = vshrl.u32 %v3604_v55, 16 }
 0x23b   : > { %v1635_v54 = vpop.f32.mrf.mxu3 }
 0x23c   : > { %v4311_v4 = vpop.f32.mrf.mxu0  ;;  %v1310_v15 = vpop.f32.mrf.mxu2 }
 0x23d   : > { %v1636_v28 = vadd.f32 %v1635_v54, %v1310_v15  ;;  %v1402_v54 = vrot.slane %v1400_v51, 3 }
 0x241   : > { %1597 = vmatmul.bf16.vlgmr.msrb.gmra.mxu2 %v4158_v33  ;;  %v1393_v33 = vrot.slane %v1391_v5, 3 }
 0x243   : > { %v1638_v32 = vpop.f32.mrf.mxu3  ;;  %v1397_v46 = vor.u32 %v1396_v62, %v1393_v33 }
 0x244   : > { %v2051_v40 = vpop.f32.mrf.mxu0  ;;  %v1313_v26 = vpop.f32.mrf.mxu2 }
 0x245   : > { %v4314_v19 = vadd.f32 %v2051_v40, %v1634_v60  ;;  %v1639_v45 = vadd.f32 %v1638_v32, %v1313_v26  ;;  %v1398_v2 = vsel %vm1372_vm1, %v4154_v30, %v1397_v46  ;;  %v1403_v60 = vshll.u32 %v3604_v55, 16  ;;  %v3450_v32 = vld [vmem:[%s4951_s5 + $0x38] sm:$0xff]  ;;  %v3605_v26 = vld [vmem:[#allocation2 + $0x20] sm:$0xff]  }
 0x246   : > { %2615 = vmatpush.bf16.msrb.mxu3 %v3450_v32  ;;  %v1409_v34 = vshrl.u32 %v3605_v26, 16  ;;  %v1412_v33 = vshll.u32 %v3605_v26, 16 }
 0x247   : > { %2090 = vmatmul.bf16.gmra.mxu0 %v1942_v43  ;;  %v1405_v15 = vrot.slane %v1403_v60, 4 }
 0x249   : > { %v1406_v18 = vor.u32 %v1405_v15, %v1402_v54  ;;  %v3449_v15 = vld [vmem:[%s4951_s5 + $0x30] sm:$0xff] }
 0x24a   : > { %2616 = vmatpush.bf16.msrb.mxu3 %v3449_v15 }
 0x24b   : > { %v1640_v47 = vpop.f32.mrf.mxu3  ;;  %v1407_v40 = vsel %vm1372_vm1, %v1397_v46, %v1406_v18 }
 0x24c   : > { %v2053_v50 = vpop.f32.mrf.mxu0  ;;  %v1315_v10 = vpop.f32.mrf.mxu2 }
 0x24d   : > { %v4320_v53 = vadd.f32 %v2053_v50, %v1636_v28  ;;  %v1641_v16 = vadd.f32 %v1640_v47, %v1315_v10  ;;  %v2215_v28 = vld [vmem:[%s4953_s7 + $0x68] sm:$0xff]  ;;  %v1411_v47 = vrot.slane %v1409_v34, 3  ;;  %v1414_v50 = vrot.slane %v1412_v33, 4  ;;  %v2213_v34 = vld [vmem:[%s4953_s7 + $0x58] sm:$0xff] }
 0x24e   : > { %2220 = vmatpush.msra.mxu1 %v2215_v28 }
 0x251   : > { %1602 = vmatmul.bf16.gmra.mxu2 %v1398_v2 }
 0x253   : > { %v1643_v7 = vpop.f32.mrf.mxu3 }
 0x254   : > { %v2056_v0 = vpop.f32.mrf.mxu0  ;;  %v1318_v3 = vpop.f32.mrf.mxu2 }
 0x255   : > { %v4324_v1 = vadd.f32 %v2056_v0, %v1639_v45  ;;  %v1644_v6 = vadd.f32 %v1643_v7, %v1318_v3  ;;  %v1415_v7 = vor.u32 %v1414_v50, %v1411_v47  ;;  %v3606_v3 = vld [vmem:[#allocation2 + $0x28] sm:$0xff]  }
 0x256   : > { %v1418_v35 = vshrl.u32 %v3606_v3, 16  ;;  %v1421_v54 = vshll.u32 %v3606_v3, 16 }
 0x257   : > { %v1416_v0 = vsel %vm1372_vm1, %v1406_v18, %v1415_v7 }
 0x25b   : > { %v1645_v17 = vpop.f32.mrf.mxu3 }
 0x25c   : > { %v2058_v30 = vpop.f32.mrf.mxu0  ;;  %v1320_v25 = vpop.f32.mrf.mxu2 }
 0x25d   : > { %v4329_v36 = vadd.f32 %v2058_v30, %v1641_v16  ;;  %v1646_v10 = vadd.f32 %v1645_v17, %v1320_v25  ;;  %v2214_v16 = vld [vmem:[%s4953_s7 + $0x60] sm:$0xff]  ;;  %v1420_v17 = vrot.slane %v1418_v35, 3  ;;  %v1423_v30 = vrot.slane %v1421_v54, 4  ;;  %v2211_v35 = vld [vmem:[%s4953_s7 + $0x48] sm:$0xff]  ;;  %v3446_v54 = vld [vmem:[%s4951_s5 + $0x18] sm:$0xff] }
 0x25e   : > { %2221 = vmatpush.msra.mxu1 %v2214_v16 }
 0x25f   : > { %v1424_v18 = vor.u32 %v1423_v30, %v1420_v17  ;;  %v3445_v17 = vld [vmem:[%s4951_s5 + $0x10] sm:$0xff] }
 0x260   : > { %2222 = vmatpush.msra.mxu1 %v2213_v34 }
 0x261   : > { %1607 = vmatmul.bf16.gmra.mxu2 %v1407_v40  ;;  %v1425_v32 = vsel %vm1372_vm1, %v1415_v7, %v1424_v18  ;;  %v3607_v40 = vld [vmem:[#allocation2 + $0x30] sm:$0xff]  }
 0x262   : > { %v2212_v7 = vld [vmem:[%s4953_s7 + $0x50] sm:$0xff] }
 0x263   : > { %v1648_v45 = vpop.f32.mrf.mxu3  ;;  %2223 = vmatpush.msra.mxu1 %v2212_v7 }
 0x264   : > { %v2061_v5 = vpop.f32.mrf.mxu0  ;;  %v1323_v43 = vpop.f32.mrf.mxu2 }
 0x265   : > { %v4335_v38 = vadd.f32 %v2061_v5, %v1644_v6  ;;  %v1649_v62 = vadd.f32 %v1648_v45, %v1323_v43  ;;  %v1427_v5 = vshrl.u32 %v3607_v40, 16  ;;  %v1430_v43 = vshll.u32 %v3607_v40, 16  ;;  %v3448_v45 = vld [vmem:[%s4951_s5 + $0x28] sm:$0xff]  ;;  %2224 = vmatpush.msra.mxu1 %v2211_v35 }
 0x266   : > { %2617 = vmatpush.bf16.msrb.mxu3 %v3448_v45  ;;  %v3444_v40 = vld [vmem:[%s4951_s5 + $0x8] sm:$0xff]  ;;  %v2208_v45 = vld [vmem:[%s4953_s7 + $0x30] sm:$0xff] }
 0x267   : > { %v1429_v33 = vrot.slane %v1427_v5, 3 }
 0x26c   : > { %v2063_v46 = vpop.f32.mrf.mxu0  ;;  %v4342_v55 = vpop.f32.mrf.mxu2 }
 0x26d   : > { %v4340_v2 = vadd.f32 %v2063_v46, %v1646_v10  ;;  %v3447_v46 = vld [vmem:[%s4951_s5 + $0x20] sm:$0xff] }
 0x26e   : > { %2618 = vmatpush.bf16.msrb.mxu3 %v3447_v46 }
 0x271   : > { %1612 = vmatmul.bf16.gmra.mxu2 %v1416_v0 }
 0x272   : > { %2619 = vmatpush.bf16.msrb.mxu3 %v3446_v54 }
 0x274   : > { %v2066_v51 = vpop.f32.mrf.mxu0  ;;  %v4347_v6 = vpop.f32.mrf.mxu2 }
 0x275   : > { %v4345_v60 = vadd.f32 %v2066_v51, %v1649_v62  ;;  %v1432_v62 = vrot.slane %v1430_v43, 4 }
 0x276   : > { %2620 = vmatpush.bf16.msrb.mxu3 %v3445_v17 }
 0x277   : > { %4963 = vst [vmem:[#allocation6_spill] sm:$0xff] %v4345_v60  ;;  %v1433_v47 = vor.u32 %v1432_v62, %v1429_v33  ;;  %v3427_v33 = vld [vmem:[%s3963_s21] sm:$0xff]  ;;  %v3428_v62 = vld [vmem:[%s3963_s21 + $0x8] sm:$0xff] }
 0x278   : > { %v2420_v46 = vshrl.u32 %v3427_v33, 16 }
 0x279   : > { %v1434_v50 = vsel %vm1372_vm1, %v1424_v18, %v1433_v47  ;;  %v1443_v3 = vsel %vm1372_vm1, %v1433_v47, %v4207_v27  ;;  %v2210_v27 = vld [vmem:[%s4953_s7 + $0x40] sm:$0xff]  ;;  %v2422_v47 = vshll.u32 %v3427_v33, 16  ;;  %v3429_v33 = vld [vmem:[%s3963_s21 + $0x10] sm:$0xff] }
 0x27a   : > { %2225 = vmatpush.msra.mxu1 %v2210_v27  ;;  %2621 = vmatpush.bf16.msrb.mxu3 %v3444_v40 }
 0x27b   : > { %v2424_v7 = vrot.slane %v2422_v47, 1 }
 0x27c   : > { %v4355_v25 = vpop.f32.mrf.mxu2  ;;  %v4418_v40 = vpop.f32.mrf.mxu0 }
 0x27d   : > { %v2425_v54 = vor.u32 %v2424_v7, %v2420_v46  ;;  %v2435_v46 = vshll.u32 %v3429_v33, 16 }
 0x281   : > { %1617 = vmatmul.bf16.gmra.mxu2 %v1425_v32  ;;  %v2209_v32 = vld [vmem:[%s4953_s7 + $0x38] sm:$0xff] }
 0x282   : > { %2226 = vmatpush.msra.mxu1 %v2209_v32  ;;  %v4416_v32 = vpop.f32.mrf.mxu3 }
 0x284   : > { %v4358_v26 = vpop.f32.mrf.mxu2  ;;  %2227 = vmatpush.msra.mxu1 %v2208_v45  ;;  %v2207_v45 = vld [vmem:[%s4953_s7 + $0x28] sm:$0xff]  ;;  %v4426_v7 = vpop.f32.mrf.mxu0 }
 0x285   : > { %4964 = vst [vmem:[#allocation7_spill] sm:$0xff] %v4358_v26 }
 0x286   : > { %2228 = vmatpush.msra.mxu1 %v2207_v45  ;;  %4972 = vst [vmem:[#allocation15_spill] sm:$0xff] %v4426_v7 }
 0x28a   : > { %v4424_v47 = vpop.f32.mrf.mxu3 }
 0x28c   : > { %v4366_v28 = vpop.f32.mrf.mxu2 }
 0x28d   : > { %4965 = vst [vmem:[#allocation8_spill] sm:$0xff] %v4366_v28 }
 0x291   : > { %1622 = vmatmul.bf16.gmra.mxu2 %v1434_v50  ;;  %v3443_v50 = vld [vmem:[%s4951_s5] sm:$0xff] }
 0x292   : > { %2622 = vmatpush.bf16.msrb.mxu3 %v3443_v50  ;;  %v2431_v50 = vshrl.u32 %v3428_v62, 16  ;;  %v4432_v45 = vpop.f32.mrf.mxu3 }
 0x294   : > { %v4369_v10 = vpop.f32.mrf.mxu2 }
 0x295   : > { %4966 = vst [vmem:[#allocation9_spill] sm:$0xff] %v4369_v10  ;;  %v2439_v10 = vshrl.u32 %v3429_v33, 16 }
 0x29c   : > { %v4377_v0 = vpop.f32.mrf.mxu2 }
 0x29d   : > { %4967 = vst [vmem:[#allocation10_spill] sm:$0xff] %v4377_v0  ;;  %v4434_v0 = vpop.f32.mrf.mxu0 }
 0x29e   : > { %4973 = vst [vmem:[#allocation16_spill] sm:$0xff] %v4434_v0 }
 0x2a1   : > { %1627 = vmatmul.bf16.gmra.mxu2 %v1443_v3  ;;  %v2427_v3 = vshll.u32 %v3428_v62, 16  ;;  %v3430_v62 = vld [vmem:[%s3963_s21 + $0x18] sm:$0xff] }
 0x2a2   : > { %v2443_v28 = vshll.u32 %v3430_v62, 16 }
 0x2a3   : > { %v2429_v27 = vrot.slane %v2427_v3, 1 }
 0x2a4   : > { %v4381_v51 = vpop.f32.mrf.mxu2 }
 0x2a5   : > { %4968 = vst [vmem:[#allocation11_spill] sm:$0xff] %v4381_v51  ;;  %v2430_v17 = vsel %vm481_vm0, %v2425_v54, %v2429_v27  ;;  %v2433_v54 = vor.u32 %v2431_v50, %v2429_v27  ;;  %v2445_v50 = vrot.slane %v2443_v28, 1 }
 0x2a6   : > { %2623 = vmatmul.bf16.vlgmr.msrb.gmra.mxu3 %v2430_v17  ;;  %v2437_v17 = vrot.slane %v2435_v46, 1  ;;  %v4437_v46 = vpop.f32.mrf.mxu3 }
 0x2a7   : > { %4974 = vst [vmem:[#allocation17_spill] sm:$0xff] %v4437_v46 }
 0x2a8   : > { %v2441_v27 = vor.u32 %v2439_v10, %v2437_v17 }
 0x2ac   : > { %v4389_v15 = vpop.f32.mrf.mxu2 }
 0x2ad   : > { %4969 = vst [vmem:[#allocation12_spill] sm:$0xff] %v4389_v15  ;;  %v2206_v15 = vld [vmem:[%s4953_s7 + $0x20] sm:$0xff] }
 0x2ae   : > { %2229 = vmatpush.msra.mxu1 %v2206_v15  ;;  %v2205_v15 = vld [vmem:[%s4953_s7 + $0x18] sm:$0xff]  ;;  %v4448_v28 = vpop.f32.mrf.mxu3 }
 0x2b0   : > { %2230 = vmatpush.msra.mxu1 %v2205_v15  ;;  %v4458_v15 = vld [vmem:[%s4950_s4] ss:$0 sm:$0xff] }
 0x2b4   : > { %v4391_v16 = vpop.f32.mrf.mxu2 }
 0x2b5   : > { %4970 = vst [vmem:[#allocation13_spill] sm:$0xff] %v4391_v16  ;;  %v2438_v16 = vsel %vm481_vm0, %v2433_v54, %v2437_v17  ;;  %v4440_v54 = vpop.f32.mrf.mxu0  ;;  %v3431_v17 = vld [vmem:[%s3963_s21 + $0x20] sm:$0xff] }
 0x2b6   : > { %2628 = vmatmul.bf16.gmra.mxu3 %v2438_v16  ;;  %v2446_v16 = vsel %vm481_vm0, %v2441_v27, %v2445_v50  ;;  %4975 = vst [vmem:[#allocation18_spill] sm:$0xff] %v4440_v54  ;;  %v2447_v54 = vshrl.u32 %v3430_v62, 16  ;;  %v2451_v7 = vshll.u32 %v3431_v17, 16 }
 0x2bc   : > { %v4399_v30 = vpop.f32.mrf.mxu2 }
 0x2bd   : > { %4971 = vst [vmem:[#allocation14_spill] sm:$0xff] %v4399_v30  ;;  %v4451_v46 = vpop.f32.mrf.mxu0 }
 0x2c4   : > { %v1598_v18 = vpop.f32.mrf.mxu2 }
 0x2c5   : > { %v1599_v0 = vadd.f32 %v1598_v18, %v4220_v63 }
 0x2c6   : > { %2633 = vmatmul.bf16.gmra.mxu3 %v2446_v16 }
 0x2c7   : > { %v2096_v63 = vadd.f32 %v4230_v44, %v1599_v0 }
 0x2cc   : > { %v1600_v5 = vpop.f32.mrf.mxu2 }
 0x2cd   : > { %v1601_v33 = vadd.f32 %v1600_v5, %v4224_v23  ;;  %v2449_v5 = vor.u32 %v2447_v54, %v2445_v50 }
 0x2cf   : > { %v2097_v27 = vadd.f32 %v4235_v57, %v1601_v33  ;;  %v4470_v33 = vadd.f32 %v4458_v15, %v2096_v63 }
 0x2d1   : > { %v4464_v57 = vadd.f32 %v4458_v15, %v2097_v27 }
 0x2d3   : > { %v2164_v0 = vadd.f32 %v4464_v57, %v4470_v33 }
 0x2d4   : > { %v1603_v43 = vpop.f32.mrf.mxu2 }
 0x2d5   : > { %v1604_v10 = vadd.f32 %v1603_v43, %v4232_v48  ;;  %v2453_v43 = vrot.slane %v2451_v7, 1  ;;  %v4486_v7 = vpop.f32.mrf.mxu0 }
 0x2d7   : > { %v2098_v23 = vadd.f32 %v4244_v9, %v1604_v10  ;;  %v2454_v62 = vsel %vm481_vm0, %v2449_v5, %v2453_v43 }
 0x2d8   : > { %2638 = vmatmul.bf16.gmra.mxu3 %v2454_v62 }
 0x2d9   : > { %v4473_v44 = vadd.f32 %v4458_v15, %v2098_v23 }
 0x2dc   : > { %v1605_v34 = vpop.f32.mrf.mxu2 }
 0x2dd   : > { %v1606_v16 = vadd.f32 %v1605_v34, %v4238_v59 }
 0x2df   : > { %v2099_v59 = vadd.f32 %v4249_v22, %v1606_v16 }
 0x2e1   : > { %v4480_v22 = vadd.f32 %v4458_v15, %v2099_v59 }
 0x2e4   : > { %v1608_v35 = vpop.f32.mrf.mxu2 }
 0x2e5   : > { %v1609_v48 = vadd.f32 %v1608_v35, %v4246_v14  ;;  %v4484_v35 = vpop.f32.mrf.mxu3 }
 0x2e7   : > { %v2100_v9 = vadd.f32 %v4258_v29, %v1609_v48  ;;  %v2165_v29 = vadd.f32 %v2164_v0, %v4473_v44 }
 0x2e9   : > { %v2166_v10 = vadd.f32 %v2165_v29, %v4480_v22  ;;  %v3433_v29 = vld [vmem:[%s3963_s21 + $0x30] sm:$0xff] }
 0x2ec   : > { %v1610_v30 = vpop.f32.mrf.mxu2 }
 0x2ed   : > { %v1611_v34 = vadd.f32 %v1610_v30, %v4252_v24 }
 0x2ef   : > { %v2101_v24 = vadd.f32 %v4263_v31, %v1611_v34 }
 0x2f1   : > { %v4496_v31 = vadd.f32 %v4458_v15, %v2101_v24  ;;  %v2204_v24 = vld [vmem:[%s4953_s7 + $0x10] sm:$0xff] }
 0x2f2   : > { %2231 = vmatpush.msra.mxu1 %v2204_v24 }
 0x2f4   : > { %v1613_v3 = vpop.f32.mrf.mxu2 }
 0x2f5   : > { %v1614_v14 = vadd.f32 %v1613_v3, %v4260_v52  ;;  %v4490_v52 = vadd.f32 %v4458_v15, %v2100_v9  ;;  %v4519_v9 = vpop.f32.mrf.mxu3 }
 0x2f7   : > { %v2102_v3 = vadd.f32 %v4272_v13, %v1614_v14  ;;  %v2167_v27 = vadd.f32 %v2166_v10, %v4490_v52 }
 0x2f9   : > { %v4502_v16 = vadd.f32 %v4458_v15, %v2102_v3 }
 0x2fc   : > { %v1615_v51 = vpop.f32.mrf.mxu2 }
 0x2fd   : > { %v1616_v30 = vadd.f32 %v1615_v51, %v4266_v61 }
 0x2ff   : > { %v2103_v61 = vadd.f32 %v4277_v42, %v1616_v30  ;;  %v2203_v30 = vld [vmem:[%s4953_s7 + $0x8] sm:$0xff] }
 0x300   : > { %2232 = vmatpush.msra.mxu1 %v2203_v30  ;;  %v4976_v30 = vld [vmem:[#allocation15_spill] sm:$0xff] }
 0x301   : > { %v4509_v23 = vadd.f32 %v4458_v15, %v2103_v61 }
 0x304   : > { %v1618_v26 = vpop.f32.mrf.mxu2 }
 0x305   : > { %v1619_v50 = vadd.f32 %v1618_v26, %v4274_v58  ;;  %v3432_v58 = vld [vmem:[%s3963_s21 + $0x28] sm:$0xff]  ;;  %v2168_v26 = vadd.f32 %v2167_v27, %v4496_v31  ;;  %v2467_v27 = vshll.u32 %v3433_v29, 16 }
 0x307   : > { %v2104_v63 = vadd.f32 %v4286_v49, %v1619_v50  ;;  %v2169_v5 = vadd.f32 %v2168_v26, %v4502_v16  ;;  %v2202_v50 = vld [vmem:[%s4953_s7] sm:$0xff]  ;;  %v1668_v26 = vpop.f32.mrf.mxu3 }
 0x308   : > { %2233 = vmatpush.msra.mxu1 %v2202_v50  ;;  %v4977_v50 = vld [vmem:[#allocation6_spill] sm:$0xff] }
 0x309   : > { %v4515_v59 = vadd.f32 %v4458_v15, %v2104_v63 }
 0x30c   : > { %v1620_v60 = vpop.f32.mrf.mxu2 }
 0x30d   : > { %v1621_v51 = vadd.f32 %v1620_v60, %v4280_v37  ;;  %v2455_v37 = vshrl.u32 %v3431_v17, 16  ;;  %v2459_v60 = vshll.u32 %v3432_v58, 16 }
 0x30f   : > { %v2105_v48 = vadd.f32 %v4293_v8, %v1621_v51  ;;  %v2457_v34 = vor.u32 %v2455_v37, %v2453_v43  ;;  %v2461_v62 = vrot.slane %v2459_v60, 1  ;;  %v4521_v8 = vpop.f32.mrf.mxu0  ;;  %v2463_v51 = vshrl.u32 %v3432_v58, 16 }
 0x310   : > { %v4566_v58 = vadd.f32 %v4458_v15, %v4320_v53 }
 0x311   : > { %v4525_v17 = vadd.f32 %v4458_v15, %v2105_v48  ;;  %v2462_v0 = vsel %vm481_vm0, %v2457_v34, %v2461_v62  ;;  %v2465_v60 = vor.u32 %v2463_v51, %v2461_v62  ;;  %v3434_v51 = vld [vmem:[%s3963_s21 + $0x38] sm:$0xff] }
 0x312   : > { %2643 = vmatmul.bf16.gmra.mxu3 %v2462_v0 }
 0x314   : > { %v1623_v18 = vpop.f32.mrf.mxu2 }
 0x315   : > { %v1624_v13 = vadd.f32 %v1623_v18, %v4288_v56 }
 0x317   : > { %v2106_v49 = vadd.f32 %v4298_v21, %v1624_v13  ;;  %v2086_v48 = vpop.f32.mrf.mxu0 }
 0x31c   : > { %v1625_v54 = vpop.f32.mrf.mxu2 }
 0x31d   : > { %v1626_v42 = vadd.f32 %v1625_v54, %v4295_v12  ;;  %v2170_v12 = vadd.f32 %v2169_v5, %v4509_v23  ;;  %v2469_v5 = vrot.slane %v2467_v27, 1 }
 0x31f   : > { %v2107_v14 = vadd.f32 %v4303_v39, %v1626_v42  ;;  %v2171_v21 = vadd.f32 %v2170_v12, %v4515_v59  ;;  %v1670_v12 = vpop.f32.mrf.mxu3  ;;  %v2088_v53 = vpop.f32.mrf.mxu0 }
 0x321   : > { %v2172_v39 = vadd.f32 %v2171_v21, %v4525_v17  ;;  %v4543_v3 = vadd.f32 %v4458_v15, %v2107_v14  ;;  %v4582_v14 = vadd.f32 %v4458_v15, %v4335_v38  ;;  %v1654_v21 = vadd.f32 %v4424_v47, %v4347_v6  ;;  %v4978_v6 = vld [vmem:[#allocation16_spill] sm:$0xff] }
 0x322   : > { %v1656_v38 = vadd.f32 %v4432_v45, %v4355_v25  ;;  %v4981_v45 = vld [vmem:[#allocation8_spill] sm:$0xff] }
 0x323   : > { %v1661_v27 = vadd.f32 %v4448_v28, %v4981_v45 }
 0x324   : > { %v1628_v56 = vpop.f32.mrf.mxu2  ;;  %v2119_v47 = vadd.f32 %v4978_v6, %v1656_v38 }
 0x325   : > { %v1629_v18 = vadd.f32 %v1628_v56, %v4300_v11  ;;  %v4531_v11 = vadd.f32 %v4458_v15, %v2106_v49  ;;  %v4561_v49 = vadd.f32 %v4458_v15, %v4314_v19  ;;  %v2470_v56 = vsel %vm481_vm0, %v2465_v60, %v2469_v5 }
 0x326   : > { %2648 = vmatmul.bf16.gmra.mxu3 %v2470_v56  ;;  %v4577_v19 = vadd.f32 %v4458_v15, %v4329_v36  ;;  %v4591_v36 = vadd.f32 %v4458_v15, %v4340_v2  ;;  %v4619_v56 = vadd.f32 %v4458_v15, %v2119_v47  ;;  %v4988_v47 = vld [vmem:[#allocation12_spill] sm:$0xff] }
 0x327   : > { %v2108_v43 = vadd.f32 %v4308_v20, %v1629_v18  ;;  %v2173_v20 = vadd.f32 %v2172_v39, %v4531_v11  ;;  %v4572_v18 = vadd.f32 %v4458_v15, %v4324_v1  ;;  %v1651_v1 = vadd.f32 %v4416_v32, %v4342_v55 }
 0x328   : > { %v2118_v39 = vadd.f32 %v4976_v30, %v1654_v21  ;;  %v4600_v55 = vadd.f32 %v4458_v15, %v4977_v50 }
 0x329   : > { %v4550_v10 = vadd.f32 %v4458_v15, %v2108_v43  ;;  %v2174_v63 = vadd.f32 %v2173_v20, %v4543_v3  ;;  %v2117_v43 = vadd.f32 %v4418_v40, %v1651_v1  ;;  %v4979_v20 = vld [vmem:[#allocation7_spill] sm:$0xff]  ;;  %v4980_v40 = vld [vmem:[#allocation17_spill] sm:$0xff]  ;;  %v2091_v1 = vpop.f32.mrf.mxu0 }
 0x32a   : > { %v4612_v25 = vadd.f32 %v4458_v15, %v2118_v39 }
 0x32b   : > { %v2175_v42 = vadd.f32 %v2174_v63, %v4550_v10  ;;  %v4605_v2 = vadd.f32 %v4458_v15, %v2117_v43  ;;  %v1673_v63 = vpop.f32.mrf.mxu3 }
 0x32c   : > { %v1630_v54 = vpop.f32.mrf.mxu2 }
 0x32d   : > { %v1631_v61 = vadd.f32 %v1630_v54, %v4305_v41  ;;  %v1659_v54 = vadd.f32 %v4980_v40, %v4979_v20  ;;  %v1671_v20 = vadd.f32 %v1670_v12, %v4988_v47 }
 0x32f   : > { %v2109_v13 = vadd.f32 %v4311_v4, %v1631_v61  ;;  %v2125_v45 = vadd.f32 %v2088_v53, %v1671_v20 }
 0x331   : > { %v4557_v37 = vadd.f32 %v4458_v15, %v2109_v13  ;;  %v4982_v13 = vld [vmem:[#allocation18_spill] sm:$0xff] }
 0x333   : > { %v2176_v41 = vadd.f32 %v2175_v42, %v4557_v37  ;;  %v2120_v42 = vadd.f32 %v4982_v13, %v1659_v54  ;;  %v4991_v13 = vld [vmem:[#allocation13_spill] sm:$0xff] }
 0x335   : > { %v2177_v4 = vadd.f32 %v2176_v41, %v4561_v49  ;;  %v2471_v41 = vshrl.u32 %v3433_v29, 16  ;;  %v4628_v29 = vadd.f32 %v4458_v15, %v2120_v42  ;;  %v1674_v42 = vadd.f32 %v1673_v63, %v4991_v13  ;;  %v3437_v13 = vld [vmem:[%s3963_s21 + $0x50] sm:$0xff] }
 0x337   : > { %v2178_v34 = vadd.f32 %v2177_v4, %v4566_v58  ;;  %v2475_v4 = vshll.u32 %v3434_v51, 16  ;;  %v2473_v28 = vor.u32 %v2471_v41, %v2469_v5  ;;  %4985 = vst [vmem:[#allocation15_spill] sm:$0xff] %v4628_v29 }
 0x339   : > { %v2179_v62 = vadd.f32 %v2178_v34, %v4572_v18  ;;  %v4983_v34 = vld [vmem:[#allocation9_spill] sm:$0xff]  ;;  %v2477_v43 = vrot.slane %v2475_v4, 1  ;;  %v2093_v4 = vpop.f32.mrf.mxu0 }
 0x33b   : > { %v2180_v0 = vadd.f32 %v2179_v62, %v4577_v19  ;;  %v1664_v62 = vadd.f32 %v4484_v35, %v4983_v34  ;;  %v2478_v35 = vsel %vm481_vm0, %v2473_v28, %v2477_v43  ;;  %v4992_v34 = vld [vmem:[#allocation14_spill] sm:$0xff] }
 0x33c   : > { %2653 = vmatmul.bf16.gmra.mxu3 %v2478_v35 }
 0x33d   : > { %v2181_v24 = vadd.f32 %v2180_v0, %v4582_v14  ;;  %v2121_v0 = vadd.f32 %v4451_v46, %v1661_v27  ;;  %v2122_v30 = vadd.f32 %v4486_v7, %v1664_v62  ;;  %v2239_v46 = vld [vmem:[%s4954_s8] sm:$0xff]  ;;  %v1675_v27 = vpop.f32.mrf.mxu3 }
 0x33e   : > { %2259 = vmatpush.msra.mxu2 %v2239_v46  ;;  %v3435_v7 = vld [vmem:[%s3963_s21 + $0x40] sm:$0xff]  ;;  %v1676_v62 = vadd.f32 %v1675_v27, %v4992_v34  ;;  %v3438_v34 = vld [vmem:[%s3963_s21 + $0x58] sm:$0xff] }
 0x33f   : > { %v2182_v32 = vadd.f32 %v2181_v24, %v4591_v36  ;;  %v4984_v24 = vld [vmem:[#allocation10_spill] sm:$0xff]  ;;  %v4638_v5 = vadd.f32 %v4458_v15, %v2121_v0  ;;  %v4645_v40 = vadd.f32 %v4458_v15, %v2122_v30  ;;  %v2483_v41 = vshll.u32 %v3435_v7, 16 }
 0x340   : > { %v1666_v38 = vadd.f32 %v4519_v9, %v4984_v24  ;;  %v4987_v9 = vld [vmem:[#allocation11_spill] sm:$0xff]  ;;  %v2127_v53 = vadd.f32 %v2093_v4, %v1676_v62 }
 0x341   : > { %v2183_v61 = vadd.f32 %v2182_v32, %v4600_v55  ;;  %4986 = vst [vmem:[#allocation6_spill] sm:$0xff] %v4638_v5  ;;  %v1669_v32 = vadd.f32 %v1668_v26, %v4987_v9  ;;  %v2485_v24 = vrot.slane %v2483_v41, 1 }
 0x342   : > { %v2123_v50 = vadd.f32 %v4521_v8, %v1666_v38  ;;  %4989 = vst [vmem:[#allocation16_spill] sm:$0xff] %v4645_v40  ;;  %v4667_v30 = vadd.f32 %v4458_v15, %v2127_v53 }
 0x343   : > { %v2184_v60 = vadd.f32 %v2183_v61, %v4605_v2  ;;  %v2124_v54 = vadd.f32 %v2086_v48, %v1669_v32  ;;  %v2126_v48 = vadd.f32 %v2091_v1, %v1674_v42  ;;  %v2487_v32 = vshrl.u32 %v3435_v7, 16 }
 0x344   : > { %v4649_v8 = vadd.f32 %v4458_v15, %v2123_v50  ;;  %4993 = vst [vmem:[#allocation17_spill] sm:$0xff] %v4667_v30  ;;  %v3436_v50 = vld [vmem:[%s3963_s21 + $0x48] sm:$0xff] }
 0x345   : > { %v2185_v21 = vadd.f32 %v2184_v60, %v4612_v25  ;;  %v2479_v60 = vshrl.u32 %v3434_v51, 16  ;;  %v4654_v12 = vadd.f32 %v4458_v15, %v2124_v54  ;;  %v4663_v51 = vadd.f32 %v4458_v15, %v2126_v48  ;;  %v4675_v4 = vpop.f32.mrf.mxu3 }
 0x346   : > { %4990 = vst [vmem:[#allocation7_spill] sm:$0xff] %v4649_v8  ;;  %v2489_v54 = vor.u32 %v2487_v32, %v2485_v24  ;;  %v2495_v42 = vshrl.u32 %v3436_v50, 16  ;;  %v2503_v48 = vshrl.u32 %v3437_v13, 16 }
 0x347   : > { %v2186_v39 = vadd.f32 %v2185_v21, %v4619_v56  ;;  %v4659_v21 = vadd.f32 %v4458_v15, %v2125_v45  ;;  %v2481_v28 = vor.u32 %v2479_v60, %v2477_v43 }
 0x349   : > { %v2187_v6 = vadd.f32 %v2186_v39, %v4628_v29  ;;  %v2486_v39 = vsel %vm481_vm0, %v2481_v28, %v2485_v24 }
 0x34b   : > { %v2188_v61 = vadd.f32 %v2187_v6, %v4638_v5  ;;  %v2491_v6 = vshll.u32 %v3436_v50, 16 }
 0x34c   : > { %2658 = vmatmul.bf16.gmra.mxu3 %v2486_v39 }
 0x34d   : > { %v2189_v26 = vadd.f32 %v2188_v61, %v4645_v40  ;;  %v2493_v15 = vrot.slane %v2491_v6, 1  ;;  %v4679_v62 = vpop.f32.mrf.mxu3 }
 0x34f   : > { %v2190_v0 = vadd.f32 %v2189_v26, %v4649_v8  ;;  %v2494_v27 = vsel %vm481_vm0, %v2489_v54, %v2493_v15  ;;  %v2499_v26 = vshll.u32 %v3437_v13, 16  ;;  %v2497_v60 = vor.u32 %v2495_v42, %v2493_v15 }
 0x351   : > { %v2191_v63 = vadd.f32 %v2190_v0, %v4654_v12  ;;  %v2501_v41 = vrot.slane %v2499_v26, 1  ;;  %v2507_v0 = vshll.u32 %v3438_v34, 16 }
 0x353   : > { %v2192_v38 = vadd.f32 %v2191_v63, %v4659_v21  ;;  %v2502_v7 = vsel %vm481_vm0, %v2497_v60, %v2501_v41  ;;  %v2505_v53 = vor.u32 %v2503_v48, %v2501_v41  ;;  %v2509_v63 = vrot.slane %v2507_v0, 1 }
 0x355   : > { %v2193_v1 = vadd.f32 %v2192_v38, %v4663_v51  ;;  %v2510_v28 = vsel %vm481_vm0, %v2505_v53, %v2509_v63  ;;  %v4682_v24 = vpop.f32.mrf.mxu3  ;;  %v3439_v38 = vld [vmem:[%s3963_s21 + $0x60] sm:$0xff] }
 0x356   : > { %v2515_v39 = vshll.u32 %v3439_v38, 16  ;;  %v2519_v6 = vshrl.u32 %v3439_v38, 16 }
 0x357   : > { %v2194_v35 = vadd.f32 %v2193_v1, %v4667_v30  ;;  %v2511_v1 = vshrl.u32 %v3438_v34, 16  ;;  %v3442_v34 = vld [vmem:[%s3963_s21 + $0x78] sm:$0xff] }
 0x358   : > { %v2517_v50 = vrot.slane %v2515_v39, 1  ;;  %v2539_v53 = vshll.u32 %v3442_v34, 16 }
 0x359   : > { %v2195_v46 = vrot.slane %v2194_v35, 4 }
 0x35b   : > { %v2196_v43 = vadd.f32 %v2195_v46, %v2194_v35  ;;  %v2513_v46 = vor.u32 %v2511_v1, %v2509_v63  ;;  %v2315_v1 = vld [vmem:[%s3963_s21 + $0x80] sm:$0x1] }
 0x35c   : > { %2663 = vmatmul.bf16.gmra.mxu3 %v2494_v27  ;;  %v2401_v39 = vunpack.c.l.b16 %v2315_v1 }
 0x35d   : > { %v2197_v9 = vrot.slane %v2196_v43, 2  ;;  %v4685_v35 = vpop.f32.mrf.mxu3 }
 0x35f   : > { %v2198_v47 = vadd.f32 %v2197_v9, %v2196_v43  ;;  %v2518_v43 = vsel %vm481_vm0, %v2513_v46, %v2517_v50  ;;  %v3440_v9 = vld [vmem:[%s3963_s21 + $0x68] sm:$0xff]  ;;  %v2418_v46 = vpack.c.b16 %v2401_v39, %v2401_v39 }
 0x360   : > { %v2527_v27 = vshrl.u32 %v3440_v9, 16 }
 0x361   : > { %v2199_v20 = vrot.slane %v2198_v47, 1 }
 0x363   : > { %v2200_v61 = vadd.f32 %v2199_v20, %v2198_v47  ;;  %v2523_v47 = vshll.u32 %v3440_v9, 16  ;;  %v2521_v20 = vor.u32 %v2519_v6, %v2517_v50  ;;  %v2547_v9 = vshll.u32 %v2418_v46, 16 }
 0x365   : > { %v2201_v45 = vmul.f32 0.00390625, %v2200_v61  ;;  %v4689_v32 = vpop.f32.mrf.mxu3  ;;  %v2525_v54 = vrot.slane %v2523_v47, 1  ;;  %v2549_v47 = vrot.slane %v2547_v9, 1 }
 0x367   : > { %2234 = vmatmul.f32.vlgmr.msra.gmra.mxu1 %v2201_v45  ;;  %v2526_v61 = vsel %vm481_vm0, %v2521_v20, %v2525_v54  ;;  %v3441_v45 = vld [vmem:[%s3963_s21 + $0x70] sm:$0xff]  ;;  %v2529_v26 = vor.u32 %v2527_v27, %v2525_v54  ;;  %s323_s21 = sand.u32 1, %s3835_s10  }
 0x368   : > { %v2531_v13 = vshll.u32 %v3441_v45, 16  ;;  %v2535_v0 = vshrl.u32 %v3441_v45, 16  ;;  %s2915_s29 = sshll.u32 %s323_s21, 8  ;;  %s2834_s25 = scalar_lea.sflag [#allocation4], %s323_s21 }
 0x369   : > { %s4791_s14 = scalar_lea.vmem [#allocation3], %s2915_s29 }
 0x36a   : > { %v2533_v60 = vrot.slane %v2531_v13, 1  ;;  %s2846_s23 = sshll.u32 %s4791_s14, 4  ;;  %s2847_s23 = int_to_ptr.vmem [resolvable:$true] %s2846_s23 }
 0x36c   : > { %2668 = vmatmul.bf16.gmra.mxu3 %v2502_v7  ;;  %v2534_v41 = vsel %vm481_vm0, %v2529_v26, %v2533_v60  ;;  %v2537_v63 = vor.u32 %v2535_v0, %v2533_v60 }
 0x36d   : > { %v4691_v15 = vpop.f32.mrf.mxu3 }
 0x375   : > { %v4695_v42 = vpop.f32.mrf.mxu3 }
 0x37c   : > { %2673 = vmatmul.bf16.gmra.mxu3 %v2510_v28  ;;  %v2541_v28 = vrot.slane %v2539_v53, 1 }
 0x37d   : > { %v4698_v7 = vpop.f32.mrf.mxu3 }
 0x37e   : > { %v2542_v38 = vsel %vm481_vm0, %v2537_v63, %v2541_v28 }
 0x38c   : > { %2678 = vmatmul.bf16.gmra.mxu3 %v2518_v43  ;;  %v2543_v43 = vshrl.u32 %v3442_v34, 16 }
 0x38e   : > { %v2545_v6 = vor.u32 %v2543_v43, %v2541_v28 }
 0x390   : > { %v2550_v20 = vsel %vm481_vm0, %v2545_v6, %v2549_v47 }
 0x395   : > { %v4701_v48 = vpop.f32.mrf.mxu3 }
 0x39c   : > { %2683 = vmatmul.bf16.gmra.mxu3 %v2526_v61 }
 0x39d   : > { %v4705_v50 = vpop.f32.mrf.mxu3 }
 0x3a9   : > { %v4708_v54 = vpop.f32.mrf.mxu3 }
 0x3ac   : > { %2688 = vmatmul.bf16.gmra.mxu3 %v2534_v41 }
 0x3b1   : > { %v4710_v61 = vpop.f32.mrf.mxu3 }
 0x3bc   : > { %2693 = vmatmul.bf16.gmra.mxu3 %v2542_v38 }
 0x3bf   : > { %v4712_v13 = vpop.f32.mrf.mxu3 }
 0x3c7   : > { %v4714_v26 = vpop.f32.mrf.mxu3 }
 0x3cc   : > { %2698 = vmatmul.bf16.gmra.mxu3 %v2550_v20 }
 0x3cf   : > { %v4716_v60 = vpop.f32.mrf.mxu3 }
 0x3d7   : > { %v4718_v41 = vpop.f32.mrf.mxu3 }
 0x3df   : > { %v4720_v34 = vpop.f32.mrf.mxu3 }
 0x3e4   : > { %v2235_v45 = vpop.f32.mrf.mxu1 }
 0x3e5   : > { %v2238_v27 = vmax.f32 %v2235_v45, 0.0 }
 0x3e7   : > { %3253 = vmatmul.msk.f32.vlgmr.msra.gmra.mxu2 %vm2240_vm2, %v2238_v27  ;;  %v4722_v0 = vpop.f32.mrf.mxu3 }
 0x3ef   : > { %v4724_v53 = vpop.f32.mrf.mxu3 }
 0x3f7   : > { %v4726_v63 = vpop.f32.mrf.mxu3 }
 0x3ff   : > { %v4728_v28 = vpop.f32.mrf.mxu3 }
 0x407   : > { %v4730_v38 = vpop.f32.mrf.mxu3 }
 0x40f   : > { %v4732_v1 = vpop.f32.mrf.mxu3 }
 0x417   : > { %v4734_v39 = vpop.f32.mrf.mxu3 }
 0x418   : > { %4994 = vst [vmem:[#allocation8_spill] sm:$0xff] %v4734_v39 }
 0x41f   : > { %v4736_v46 = vpop.f32.mrf.mxu3 }
 0x420   : > { %4995 = vst [vmem:[#allocation18_spill] sm:$0xff] %v4736_v46 }
 0x427   : > { %v4738_v6 = vpop.f32.mrf.mxu3 }
 0x428   : > { %4996 = vst [vmem:[#allocation9_spill] sm:$0xff] %v4738_v6 }
 0x42f   : > { %v4740_v27 = vpop.f32.mrf.mxu3 }
 0x430   : > { %4997 = vst [vmem:[#allocation10_spill] sm:$0xff] %v4740_v27 }
 0x437   : > { %v4742_v40 = vpop.f32.mrf.mxu3 }
 0x438   : > { %4998 = vst [vmem:[#allocation11_spill] sm:$0xff] %v4742_v40 }
 0x43f   : > { %v2694_v27 = vpop.f32.mrf.mxu3 }
 0x46a   : > { %v2261_v43 = vpop.f32.mrf.mxu2 }
 0x46b   : > { %v2264_v9 = vsub.f32 0.0, %v2261_v43 }
 0x46d   : > { %v2265_v47 = vmul.f32 1.442695, %v2264_v9 }
 0x46f   : > { %3777 = vpow2.f32 %v2265_v47 }
 0x475   : > { %v3778_v20 = vpop.eup %3777 }
 0x476   : > { %v2267_v45 = vadd.f32 1.0, %v3778_v20 }
 0x478   : > { %3779 = vrcp.f32 %v2267_v45  ;;  %v2279_v43 = vand.u32 2147483648, %v2267_v45  ;;  %vm2273_vm4 = vweird.f32 %v2267_v45  ;;  %v2277_v6 = vand.u32 2147483647, %v2267_v45 }
 0x47a   : > { %v2280_v47 = vor.u32 1.1754944e-38, %v2279_v43  ;;  %vm2278_vm6 = vcmp.eq.f32.partialorder %v2277_v6, 8.507059e+37 }
 0x47e   : > { %v3780_v30 = vpop.eup %3779 }
 0x47f   : > { %v2269_v8 = vmul.f32 %v3780_v30, %v2267_v45  ;;  %vm2274_vm3 = vweird.f32 %v3780_v30 }
 0x480   : > { %vm2275_vm5 = vmor %vm2273_vm4, %vm2274_vm3 }
 0x481   : > { %v2270_v5 = vsub.f32 1.0, %v2269_v8  ;;  %v4750_v8 = vld [vmem:[%s4952_s6] ss:$0 sm:$0xff] }
 0x482   : > { %v2625_v45 = vadd.f32 %v4750_v8, %v4675_v4  ;;  %v2630_v43 = vadd.f32 %v4750_v8, %v4682_v24 }
 0x483   : > { %v2271_v39 = vmul.f32 %v3780_v30, %v2270_v5  ;;  %v2695_v5 = vadd.f32 %v4750_v8, %v2694_v27  ;;  %v2627_v27 = vadd.f32 %v4750_v8, %v4679_v62  ;;  %v2696_v62 = vpop.f32.mrf.mxu3 }
 0x485   : > { %v2272_v46 = vadd.f32 %v3780_v30, %v2271_v39 }
 0x487   : > { %v2276_v9 = vsel %vm2275_vm5, %v3780_v30, %v2272_v46 }
 0x488   : > { %v2281_v20 = vsel %vm2278_vm6, %v2280_v47, %v2276_v9 }
 0x489   : > { %v4744_v29 = vperm.slane %v2281_v20, 0 }
 0x48b   : > { %v2705_v39 = vmul.f32 %v4744_v29, %v4470_v33  ;;  %v2706_v30 = vmul.f32 %v4744_v29, %v4464_v57  ;;  %v2707_v46 = vmul.f32 %v4744_v29, %v4473_v44  ;;  %v2733_v6 = vmul.f32 %v4744_v29, %v4654_v12 }
 0x48c   : > { %v2708_v33 = vmul.f32 %v4744_v29, %v4480_v22  ;;  %v2632_v57 = vadd.f32 %v4750_v8, %v4685_v35  ;;  %v2635_v44 = vadd.f32 %v4750_v8, %v4689_v32  ;;  %v2709_v12 = vmul.f32 %v4744_v29, %v4490_v52 }
 0x48d   : > { %v2765_v9 = vadd.f32 %v2733_v6, %v2695_v5  ;;  %v2710_v4 = vmul.f32 %v4744_v29, %v4496_v31  ;;  %v2737_v20 = vadd.f32 %v2705_v39, %v2625_v45  ;;  %v2738_v24 = vadd.f32 %v2706_v30, %v2627_v27 }
 0x48e   : > { %v2739_v40 = vadd.f32 %v2707_v46, %v2630_v43  ;;  %v2637_v22 = vadd.f32 %v4750_v8, %v4691_v15  ;;  %v2640_v35 = vadd.f32 %v4750_v8, %v4695_v42  ;;  %v2642_v32 = vadd.f32 %v4750_v8, %v4698_v7 }
 0x48f   : > { %v2797_v47 = vmax.f32 %v2765_v9, 0.0  ;;  %v2711_v52 = vmul.f32 %v4744_v29, %v4502_v16  ;;  %v2645_v31 = vadd.f32 %v4750_v8, %v4701_v48  ;;  %v2712_v5 = vmul.f32 %v4744_v29, %v4509_v23 }
 0x490   : > { %v2740_v15 = vadd.f32 %v2708_v33, %v2632_v57  ;;  %v2697_v39 = vadd.f32 %v4750_v8, %v2696_v62  ;;  %v2713_v42 = vmul.f32 %v4744_v29, %v4515_v59  ;;  %v2714_v16 = vmul.f32 %v4744_v29, %v4525_v17 }
 0x491   : > { %2829 = vst [vmem:[%s4791_s14 + $0xe0] sm:$0xff] %v2797_v47  ;;  %v2741_v7 = vadd.f32 %v2709_v12, %v2635_v44  ;;  %v2734_v48 = vmul.f32 %v4744_v29, %v4659_v21  ;;  %v2742_v30 = vadd.f32 %v2710_v4, %v2637_v22  ;;  %v2769_v23 = vmax.f32 %v2737_v20, 0.0 }
 0x492   : > { %v2770_v46 = vmax.f32 %v2738_v24, 0.0  ;;  %v2771_v6 = vmax.f32 %v2739_v40, 0.0  ;;  %v2647_v45 = vadd.f32 %v4750_v8, %v4705_v50  ;;  %v2650_v27 = vadd.f32 %v4750_v8, %v4708_v54 }
 0x493   : > { %v2743_v59 = vadd.f32 %v2711_v52, %v2640_v35  ;;  %v2766_v43 = vadd.f32 %v2734_v48, %v2697_v39  ;;  %v2652_v17 = vadd.f32 %v4750_v8, %v4710_v61  ;;  %v2715_v21 = vmul.f32 %v4744_v29, %v4531_v11  ;;  %2801 = vst [vmem:[%s4791_s14] sm:$0xff] %v2769_v23 }
 0x494   : > { %v2744_v33 = vadd.f32 %v2712_v5, %v2642_v32  ;;  %v2772_v9 = vmax.f32 %v2740_v15, 0.0  ;;  %v2716_v40 = vmul.f32 %v4744_v29, %v4543_v3  ;;  %v2745_v50 = vadd.f32 %v2713_v42, %v2645_v31  ;;  %2802 = vst [vmem:[%s4791_s14 + $0x8] sm:$0xff] %v2770_v46 }
 0x495   : > { %v2798_v57 = vmax.f32 %v2766_v43, 0.0  ;;  %v2773_v44 = vmax.f32 %v2741_v7, 0.0  ;;  %v2655_v54 = vadd.f32 %v4750_v8, %v4712_v13  ;;  %v2717_v61 = vmul.f32 %v4744_v29, %v4550_v10  ;;  %2803 = vst [vmem:[%s4791_s14 + $0x10] sm:$0xff] %v2771_v6  ;;  %v2699_v13 = vpop.f32.mrf.mxu3 }
 0x496   : > { %v2746_v12 = vadd.f32 %v2714_v16, %v2647_v45  ;;  %v2774_v11 = vmax.f32 %v2742_v30, 0.0  ;;  %v2657_v4 = vadd.f32 %v4750_v8, %v4714_v26  ;;  %v2660_v3 = vadd.f32 %v4750_v8, %v4716_v60  ;;  %2804 = vst [vmem:[%s4791_s14 + $0x18] sm:$0xff] %v2772_v9  ;;  %v5000_v9 = vld [vmem:[#allocation8_spill] sm:$0xff] }
 0x497   : > { %v2718_v62 = vmul.f32 %v4744_v29, %v4557_v37  ;;  %2830 = vst [vmem:[%s4791_s14 + $0xe8] sm:$0xff] %v2798_v57  ;;  %v2775_v47 = vmax.f32 %v2743_v59, 0.0  ;;  %v2719_v10 = vmul.f32 %v4744_v29, %v4561_v49  ;;  %v2747_v20 = vadd.f32 %v2715_v21, %v2650_v27 }
 0x498   : > { %v2776_v24 = vmax.f32 %v2744_v33, 0.0  ;;  %v2700_v22 = vadd.f32 %v4750_v8, %v2699_v13  ;;  %v2720_v26 = vmul.f32 %v4744_v29, %v4566_v58  ;;  %v2748_v60 = vadd.f32 %v2716_v40, %v2652_v17  ;;  %2805 = vst [vmem:[%s4791_s14 + $0x20] sm:$0xff] %v2773_v44  ;;  %v4999_v17 = vld [vmem:[#allocation15_spill] sm:$0xff]  ;;  %v5001_v40 = vld [vmem:[#allocation6_spill] sm:$0xff] }
 0x499   : > { %v2777_v35 = vmax.f32 %v2745_v50, 0.0  ;;  %v2735_v37 = vmul.f32 %v4744_v29, %v4663_v51  ;;  %v2662_v32 = vadd.f32 %v4750_v8, %v4718_v41  ;;  %v2721_v49 = vmul.f32 %v4744_v29, %v4572_v18  ;;  %2806 = vst [vmem:[%s4791_s14 + $0x28] sm:$0xff] %v2774_v11  ;;  %v5002_v44 = vld [vmem:[#allocation18_spill] sm:$0xff] }
 0x49a   : > { %v2749_v52 = vadd.f32 %v2717_v61, %v2655_v54  ;;  %v2778_v31 = vmax.f32 %v2746_v12, 0.0  ;;  %v2665_v58 = vadd.f32 %v4750_v8, %v4720_v34  ;;  %v2722_v5 = vmul.f32 %v4744_v29, %v4577_v19  ;;  %2807 = vst [vmem:[%s4791_s14 + $0x30] sm:$0xff] %v2775_v47  ;;  %v5003_v54 = vld [vmem:[#allocation16_spill] sm:$0xff] }
 0x49b   : > { %v2750_v15 = vadd.f32 %v2718_v62, %v2657_v4  ;;  %v2767_v51 = vadd.f32 %v2735_v37, %v2700_v22  ;;  %v2667_v41 = vadd.f32 %v4750_v8, %v4722_v0  ;;  %v2723_v18 = vmul.f32 %v4744_v29, %v4582_v14  ;;  %2808 = vst [vmem:[%s4791_s14 + $0x38] sm:$0xff] %v2776_v24  ;;  %v5004_v4 = vld [vmem:[#allocation9_spill] sm:$0xff]  ;;  %v5005_v62 = vld [vmem:[#allocation7_spill] sm:$0xff]  ;;  %v5006_v24 = vld [vmem:[#allocation10_spill] sm:$0xff] }
 0x49c   : > { %v2751_v39 = vadd.f32 %v2719_v10, %v2660_v3  ;;  %v2779_v42 = vmax.f32 %v2747_v20, 0.0  ;;  %v2724_v34 = vmul.f32 %v4744_v29, %v4591_v36  ;;  %v2752_v16 = vadd.f32 %v2720_v26, %v2662_v32  ;;  %2809 = vst [vmem:[%s4791_s14 + $0x40] sm:$0xff] %v2777_v35  ;;  %v5007_v35 = vld [vmem:[#allocation17_spill] sm:$0xff]  ;;  %v5008_v32 = vld [vmem:[#allocation11_spill] sm:$0xff] }
 0x49d   : > { %v2780_v7 = vmax.f32 %v2748_v60, 0.0  ;;  %v2799_v19 = vmax.f32 %v2767_v51, 0.0  ;;  %v2670_v48 = vadd.f32 %v4750_v8, %v4724_v53  ;;  %v2725_v0 = vmul.f32 %v4744_v29, %v4600_v55  ;;  %2810 = vst [vmem:[%s4791_s14 + $0x48] sm:$0xff] %v2778_v31  ;;  %v2701_v20 = vpop.f32.mrf.mxu3 }
 0x49e   : > { %v2753_v30 = vadd.f32 %v2721_v49, %v2665_v58  ;;  %v2781_v14 = vmax.f32 %v2749_v52, 0.0  ;;  %v2672_v23 = vadd.f32 %v4750_v8, %v4726_v63  ;;  %v2726_v36 = vmul.f32 %v4744_v29, %v4605_v2  ;;  %2811 = vst [vmem:[%s4791_s14 + $0x50] sm:$0xff] %v2779_v42 }
 0x49f   : > { %v2754_v46 = vadd.f32 %v2722_v5, %v2667_v41  ;;  %v2782_v6 = vmax.f32 %v2750_v15, 0.0  ;;  %2831 = vst [vmem:[%s4791_s14 + $0xf0] sm:$0xff] %v2799_v19  ;;  %v2675_v53 = vadd.f32 %v4750_v8, %v4728_v28  ;;  %v2727_v55 = vmul.f32 %v4744_v29, %v4612_v25 }
 0x4a0   : > { %v2755_v45 = vadd.f32 %v2723_v18, %v2670_v48  ;;  %v2783_v27 = vmax.f32 %v2751_v39, 0.0  ;;  %v2677_v63 = vadd.f32 %v4750_v8, %v4730_v38  ;;  %v2728_v2 = vmul.f32 %v4744_v29, %v4619_v56  ;;  %2812 = vst [vmem:[%s4791_s14 + $0x58] sm:$0xff] %v2780_v7 }
 0x4a1   : > { %v2756_v59 = vadd.f32 %v2724_v34, %v2672_v23  ;;  %v2784_v43 = vmax.f32 %v2752_v16, 0.0  ;;  %v2680_v28 = vadd.f32 %v4750_v8, %v4732_v1  ;;  %v2729_v25 = vmul.f32 %v4744_v29, %v4999_v17  ;;  %2813 = vst [vmem:[%s4791_s14 + $0x60] sm:$0xff] %v2781_v14 }
 0x4a2   : > { %v2757_v21 = vadd.f32 %v2725_v0, %v2675_v53  ;;  %v2785_v33 = vmax.f32 %v2753_v30, 0.0  ;;  %v2682_v38 = vadd.f32 %v4750_v8, %v5000_v9  ;;  %v2730_v56 = vmul.f32 %v4744_v29, %v5001_v40  ;;  %2814 = vst [vmem:[%s4791_s14 + $0x68] sm:$0xff] %v2782_v6 }
 0x4a3   : > { %v2758_v50 = vadd.f32 %v2726_v36, %v2677_v63  ;;  %v2786_v57 = vmax.f32 %v2754_v46, 0.0  ;;  %v2685_v1 = vadd.f32 %v4750_v8, %v5002_v44  ;;  %v2731_v61 = vmul.f32 %v4744_v29, %v5003_v54  ;;  %2815 = vst [vmem:[%s4791_s14 + $0x70] sm:$0xff] %v2783_v27 }
 0x4a4   : > { %v2759_v12 = vadd.f32 %v2727_v55, %v2680_v28  ;;  %v2787_v11 = vmax.f32 %v2755_v45, 0.0  ;;  %v2687_v3 = vadd.f32 %v4750_v8, %v5004_v4  ;;  %v2732_v47 = vmul.f32 %v4744_v29, %v5005_v62  ;;  %2816 = vst [vmem:[%s4791_s14 + $0x78] sm:$0xff] %v2784_v43 }
 0x4a5   : > { %v2760_v13 = vadd.f32 %v2728_v2, %v2682_v38  ;;  %v2788_v10 = vmax.f32 %v2756_v59, 0.0  ;;  %v2690_v22 = vadd.f32 %v4750_v8, %v5006_v24  ;;  %v2761_v26 = vadd.f32 %v2729_v25, %v2685_v1  ;;  %2817 = vst [vmem:[%s4791_s14 + $0x80] sm:$0xff] %v2785_v33 }
 0x4a6   : > { %v2789_v60 = vmax.f32 %v2757_v21, 0.0  ;;  %v2736_v37 = vmul.f32 %v4744_v29, %v5007_v35  ;;  %v2692_v49 = vadd.f32 %v4750_v8, %v5008_v32  ;;  %v2762_v52 = vadd.f32 %v2730_v56, %v2687_v3  ;;  %2818 = vst [vmem:[%s4791_s14 + $0x88] sm:$0xff] %v2786_v57 }
 0x4a7   : > { %v2790_v31 = vmax.f32 %v2758_v50, 0.0  ;;  %v2763_v58 = vadd.f32 %v2731_v61, %v2690_v22  ;;  %v2791_v5 = vmax.f32 %v2759_v12, 0.0  ;;  %2819 = vst [vmem:[%s4791_s14 + $0x90] sm:$0xff] %v2787_v11  ;;  %v2702_v15 = vadd.f32 %v4750_v8, %v2701_v20 }
 0x4a8   : > { %v2764_v51 = vadd.f32 %v2732_v47, %v2692_v49  ;;  %v2792_v41 = vmax.f32 %v2760_v13, 0.0  ;;  %2820 = vst [vmem:[%s4791_s14 + $0x98] sm:$0xff] %v2788_v10  ;;  %v2793_v29 = vmax.f32 %v2761_v26, 0.0  ;;  %v2794_v39 = vmax.f32 %v2762_v52, 0.0 }
 0x4a9   : > { %2821 = vst [vmem:[%s4791_s14 + $0xa0] sm:$0xff] %v2789_v60  ;;  %v2768_v18 = vadd.f32 %v2736_v37, %v2702_v15  ;;  %v2795_v42 = vmax.f32 %v2763_v58, 0.0 }
 0x4aa   : > { %2822 = vst [vmem:[%s4791_s14 + $0xa8] sm:$0xff] %v2790_v31  ;;  %v2796_v8 = vmax.f32 %v2764_v51, 0.0 }
 0x4ab   : > { %2823 = vst [vmem:[%s4791_s14 + $0xb0] sm:$0xff] %v2791_v5  ;;  %v2800_v34 = vmax.f32 %v2768_v18, 0.0 }
 0x4ac   : > { %2824 = vst [vmem:[%s4791_s14 + $0xb8] sm:$0xff] %v2792_v41 }
 0x4ad   : > { %2825 = vst [vmem:[%s4791_s14 + $0xc0] sm:$0xff] %v2793_v29 }
 0x4ae   : > { %2826 = vst [vmem:[%s4791_s14 + $0xc8] sm:$0xff] %v2794_v39 }
 0x4af   : > { %2827 = vst [vmem:[%s4791_s14 + $0xd0] sm:$0xff] %v2795_v42 }
 0x4b0   : > { %2828 = vst [vmem:[%s4791_s14 + $0xd8] sm:$0xff] %v2796_v8 }
 0x4b1   : > { %2832 = vst [vmem:[%s4791_s14 + $0xf8] sm:$0xff] %v2800_v34 }
 0x4b2   : > { %3808 = shalt.err (!%p3805_p3)
}
 0x4b3   : > { %s3846_s21 = smov 128   ;;  %s3847_s14 = smov 8  }
 0x4b4   : > { %3732 = dma.vmem_to_hbm [thread:$0]  (%p3936_p5), %s2847_s23, 4096, %s2849_s24, %s2834_s25, %s3846_s21, %s3846_s21, %s3847_s14  }
 0x4b5 PF: > { %p3738_p4 = scmp.ge.s32.totalorder %s3843_s12, 2  ;;  %s2863_s22 = sand.u32 1, %s3831_s30  }
 0x4b6   : > { %s2864_s28 = scalar_lea.sflag [#allocation4], %s2863_s22 }
 0x4b7   : > { %p3735_p7 = pnand %p3738_p4, %p3940_p6 }
 0x4b9   : > { %p3736_p8 = pneg %p3735_p7 }
 0x4bb   : > { %3826 = dma.done.wait (%p3736_p8), %s2864_s28, 4096  }
 0x4bc   : > { %3828 = vsyncadd (%p3736_p8), %s2864_s28, 4294963200  ;;  %p19_p9 = scmp.ge.s32.totalorder %s3923_s15, 4   ;;  %s5009_s30 = smov %s3835_s10 }
 0x4bd   : > { %s5010_s10 = smov %s3839_s11  ;;  %s5011_s11 = smov %s3934_s18 }
 0x4be   : > { %s5012_s12 = smov %s3923_s15  ;;  %21 = sbr.rel (!%p19_p9) target bundleno = 3 (0x3), region = 94 }
 0x4c3   :  { %2870 = vsyncpa [#allocation4], 1 }
 0x4c4   :  { %2872 = vsyncpa [#allocation4 + $0x1], 1 }

</bundles_post_ra>
